<compile_context>
chip_gen: v7x
topology: tpu7x:2x2x1
jax: 0.10.0
libtpu: 0.0.40
codegen_flags: <defaults>
</compile_context>

<pallas_src>
import jax
import jax.numpy as jnp
from jax.experimental import pallas as pl
from jax.experimental.pallas import tpu as pltpu

# ----------------------------- config (small synthetic sizes) -----------------------------
BATCH = 2
C_IN = 4
H = W = 16
HW = H * W
K_IN = C_IN * HW          # 1024: encoder matmul contraction (lane-dense)
DIM_MLP = 32              # stand-in for resnet50's 2048-d pooled feature
DIM = 8                   # MoCo embedding dim
QUEUE_SIZE = 128          # stand-in for 6400 (keeps the queue axis a 128-multiple)
MOMENTUM = 0.999
TEMPERATURE = 0.07
EPS = 1e-12               # torch F.normalize eps

# ring-buffer enqueue never wraps mid-batch (implicit assumption of the torch code)
assert QUEUE_SIZE % BATCH == 0


# ----------------------------- fused kernel ------------------------------------------------
def _normalize_rows(x):
    # torch F.normalize(dim=1): x / max(||x||, eps)  ==  x * rsqrt(max(||x||^2, eps^2))
    sumsq = jnp.sum(x * x, axis=1, keepdims=True)
    return x * jax.lax.rsqrt(jnp.maximum(sumsq, EPS * EPS))


def fused_moco_kernel(ptr_ref,                                   # scalar prefetch (SMEM)
                      xq_ref, xk_ref,
                      wq_enc_ref, bq_enc_ref,
                      wk_enc_ref, bk_enc_ref,
                      w_proj_ref, b_proj_ref,
                      queue_ref,
                      l_pos_ref, l_other_ref, queue_out_ref):
    inv_t = 1.0 / TEMPERATURE
    w_proj = w_proj_ref[...]
    b_proj = b_proj_ref[...]

    def encode(x, w_enc, b_enc):
        # global-avg-pool pre-folded into w_enc (rows repeated over HW, scaled by 1/HW),
        # so the encoder stub is one (B, C*HW) @ (C*HW, DIM_MLP) MXU matmul.
        h = jnp.dot(x, w_enc, preferred_element_type=jnp.float32) + b_enc
        h = jnp.maximum(h, 0.0)                       # trailing nn.ReLU of the encoder
        h = _normalize_rows(h)                        # F.normalize(feat, dim=1)
        z = jnp.dot(h, w_proj, preferred_element_type=jnp.float32) + b_proj
        return _normalize_rows(z)                     # F.normalize(proj(feat), dim=1)

    q = encode(xq_ref[...], wq_enc_ref[...], bq_enc_ref[...])
    k = encode(xk_ref[...], wk_enc_ref[...], bk_enc_ref[...])

    # logits pieces (the 129-wide concat is done outside the kernel -> lane-dense stores here)
    l_pos_ref[...] = jnp.sum(q * k, axis=1, keepdims=True) * inv_t               # (B, 1)
    l_other_ref[...] = jax.lax.dot_general(                                      # (B, QUEUE)
        q, queue_ref[...], (((1,), (1,)), ((), ())),
        preferred_element_type=jnp.float32) * inv_t

    # dequeue_and_enqueue: keys written into the aliased queue at queue_ptr (uses the
    # *input* queue for l_other above, matching torch which reads the queue pre-enqueue).
    ptr = ptr_ref[0]
    queue_out_ref[...] = queue_ref[...]
    queue_out_ref[pl.ds(ptr, BATCH), :] = k


# flat operand index of `queue` for input_output_aliases:
# 1 scalar-prefetch arg + 8 tensor args before it.
_QUEUE_OPERAND_IDX = 1 + 8


def fused_moco_step(ptr_arr, xq, xk, wq_enc_big, bq_enc, wk_enc_big, bk_enc,
                    w_proj, b_proj, queue):
    b = xq.shape[0]

    def full2d(shape):
        return pl.BlockSpec(shape, lambda i, ptr: (0, 0))

    in_specs = [
        full2d((b, K_IN)), full2d((b, K_IN)),
        full2d((K_IN, DIM_MLP)), full2d((1, DIM_MLP)),
        full2d((K_IN, DIM_MLP)), full2d((1, DIM_MLP)),
        full2d((DIM_MLP, DIM)), full2d((1, DIM)),
        full2d((QUEUE_SIZE, DIM)),
    ]
    out_specs = [full2d((b, 1)), full2d((b, QUEUE_SIZE)), full2d((QUEUE_SIZE, DIM))]
    out_shape = (
        jax.ShapeDtypeStruct((b, 1), jnp.float32),
        jax.ShapeDtypeStruct((b, QUEUE_SIZE), jnp.float32),
        jax.ShapeDtypeStruct((QUEUE_SIZE, DIM), jnp.float32),
    )
    return pl.pallas_call(
        fused_moco_kernel,
        out_shape=out_shape,
        grid_spec=pltpu.PrefetchScalarGridSpec(
            num_scalar_prefetch=1,
            grid=(1,),   # toy sizes fit one block; tile batch/queue ("parallel") at real sizes
            in_specs=in_specs,
            out_specs=out_specs,
        ),
        compiler_params=pltpu.CompilerParams(
            dimension_semantics=("arbitrary",),
            vmem_limit_bytes=32 * 1024 * 1024,
        ),
        # queue (last tensor operand, after the scalar-prefetch arg) aliases output 2 so the
        # enqueue is in-place and XLA never copies the whole queue.
        input_output_aliases={_QUEUE_OPERAND_IDX: 2},
    )(ptr_arr, xq, xk, wq_enc_big, bq_enc, wk_enc_big, bk_enc, w_proj, b_proj, queue)


# ----------------------------- forward (MoCo glue) ------------------------------------------
@jax.jit
def moco_forward(params_q, params_k, proj, queue, queue_ptr, queue_lts, im_q, im_k, label):
    b = im_q.shape[0]

    # _momentum_update_key_encoder (forward-only script, so no stop_gradient needed)
    params_k = jax.tree_util.tree_map(
        lambda pk, pq: pk * MOMENTUM + pq * (1.0 - MOMENTUM), params_k, params_q)

    def expand_enc(w_enc):
        # fold the spatial global-average-pool into the first matmul:
        #   gap(x) @ w  ==  x.reshape(B, C*HW) @ repeat(w / HW, HW, axis=0)
        return jnp.repeat(w_enc * (1.0 / HW), HW, axis=0)

    xq = im_q.reshape(b, K_IN)
    xk = im_k.reshape(b, K_IN)
    ptr_arr = jnp.reshape(queue_ptr, (1,)).astype(jnp.int32)

    l_pos, l_other, new_queue = fused_moco_step(
        ptr_arr, xq, xk,
        expand_enc(params_q["w_enc"]), params_q["b_enc"],
        expand_enc(params_k["w_enc"]), params_k["b_enc"],
        proj["w"], proj["b"], queue)

    # logits = cat([l_pos, l_other], dim=1) / T   (scaling already done in-kernel)
    logits = jnp.concatenate([l_pos, l_other], axis=1)

    # inc_hl_dist: label += (label >= 3)
    label = label + (label >= 3).astype(label.dtype)

    # targets = cat([label[:, None], queue_lts (pre-enqueue) tiled over batch], dim=1)
    targets = jnp.concatenate(
        [label[:, None], jnp.tile(queue_lts[None, :], (b, 1))], axis=1)

    # label half of dequeue_and_enqueue (the keys were written in-kernel)
    new_queue_lts = jax.lax.dynamic_update_slice(queue_lts, label, (queue_ptr,))
    new_ptr = (queue_ptr + b) % QUEUE_SIZE

    return logits, targets, params_k, new_queue, new_ptr, new_queue_lts


# ----------------------------- main ----------------------------------------------------------
if __name__ == "__main__":
    key = jax.random.PRNGKey(0)
    k_imq, k_imk, k_we, k_be, k_wp, k_bp, k_queue = jax.random.split(key, 7)

    im_q = jax.random.normal(k_imq, (BATCH, C_IN, H, W), dtype=jnp.float32)
    im_k = jax.random.normal(k_imk, (BATCH, C_IN, H, W), dtype=jnp.float32)
    label = jnp.array([1, 4], dtype=jnp.int32)   # torch.long -> int32 here (x64 disabled)

    # encoder params (stub): q encoder + k encoder copied from q at init (param_k.copy_(param_q))
    params_q = {
        "w_enc": 0.1 * jax.random.normal(k_we, (C_IN, DIM_MLP), dtype=jnp.float32),
        "b_enc": 0.01 * jax.random.normal(k_be, (1, DIM_MLP), dtype=jnp.float32),
    }
    params_k = jax.tree_util.tree_map(lambda p: p, params_q)
    # shared projection head (self.proj is used for BOTH q and k in the torch module)
    proj = {
        "w": 0.1 * jax.random.normal(k_wp, (DIM_MLP, DIM), dtype=jnp.float32),
        "b": 0.01 * jax.random.normal(k_bp, (1, DIM), dtype=jnp.float32),
    }

    # queue buffer: randn(dim, Q), L2-normalized along dim=0 (as in torch), then transposed to
    # the internal (QUEUE_SIZE, DIM) "keys as rows" layout used by the kernel.
    queue_dq = jax.random.normal(k_queue, (DIM, QUEUE_SIZE), dtype=jnp.float32)
    queue_dq = queue_dq / jnp.maximum(
        jnp.sqrt(jnp.sum(queue_dq * queue_dq, axis=0, keepdims=True)), EPS)
    queue = queue_dq.T                                   # (QUEUE_SIZE, DIM)
    queue_lts = -jnp.ones((QUEUE_SIZE,), dtype=jnp.int32)
    queue_ptr = jnp.int32(0)

    logits, targets, params_k, queue, queue_ptr, queue_lts = moco_forward(
        params_q, params_k, proj, queue, queue_ptr, queue_lts, im_q, im_k, label)

    jax.block_until_ready((logits, targets, queue, queue_ptr, queue_lts))

    assert logits.shape == (BATCH, 1 + QUEUE_SIZE)
    assert targets.shape == (BATCH, 1 + QUEUE_SIZE)
    assert queue.shape == (QUEUE_SIZE, DIM)
    print("KERNEL_OK")
</pallas_src>

<mosaic_0001>
module attributes {stable_mosaic.version = 11 : i64} {
  func.func @fused_moco_kernel(%arg0: i32, %arg1: memref<1xi32, #tpu.memory_space<smem>>, %arg2: memref<2x1024xf32, #tpu.memory_space<vmem>>, %arg3: memref<2x1024xf32, #tpu.memory_space<vmem>>, %arg4: memref<1024x32xf32, #tpu.memory_space<vmem>>, %arg5: memref<1x32xf32, #tpu.memory_space<vmem>>, %arg6: memref<1024x32xf32, #tpu.memory_space<vmem>>, %arg7: memref<1x32xf32, #tpu.memory_space<vmem>>, %arg8: memref<32x8xf32, #tpu.memory_space<vmem>>, %arg9: memref<1x8xf32, #tpu.memory_space<vmem>>, %arg10: memref<128x8xf32, #tpu.memory_space<vmem>>, %arg11: memref<2x1xf32, #tpu.memory_space<vmem>>, %arg12: memref<2x128xf32, #tpu.memory_space<vmem>>, %arg13: memref<128x8xf32, #tpu.memory_space<vmem>>) attributes {dimension_semantics = [#tpu.dimension_semantics<arbitrary>], iteration_bounds = array<i64: 1>, scalar_prefetch = 1 : i64, scratch_operands = 0 : i64, tpu.core_type = #tpu.core_type<tc>, window_params = [{pipeline_mode = #tpu.pipeline_mode<synchronous>, transform_indices = @transform_0, window_bounds = array<i64: 2, 1024>}, {pipeline_mode = #tpu.pipeline_mode<synchronous>, transform_indices = @transform_1, window_bounds = array<i64: 2, 1024>}, {pipeline_mode = #tpu.pipeline_mode<synchronous>, transform_indices = @transform_2, window_bounds = array<i64: 1024, 32>}, {pipeline_mode = #tpu.pipeline_mode<synchronous>, transform_indices = @transform_3, window_bounds = array<i64: 1, 32>}, {pipeline_mode = #tpu.pipeline_mode<synchronous>, transform_indices = @transform_4, window_bounds = array<i64: 1024, 32>}, {pipeline_mode = #tpu.pipeline_mode<synchronous>, transform_indices = @transform_5, window_bounds = array<i64: 1, 32>}, {pipeline_mode = #tpu.pipeline_mode<synchronous>, transform_indices = @transform_6, window_bounds = array<i64: 32, 8>}, {pipeline_mode = #tpu.pipeline_mode<synchronous>, transform_indices = @transform_7, window_bounds = array<i64: 1, 8>}, {pipeline_mode = #tpu.pipeline_mode<synchronous>, transform_indices = @transform_8, window_bounds = array<i64: 128, 8>}, {pipeline_mode = #tpu.pipeline_mode<synchronous>, transform_indices = @transform_9, window_bounds = array<i64: 2, 1>}, {pipeline_mode = #tpu.pipeline_mode<synchronous>, transform_indices = @transform_10, window_bounds = array<i64: 2, 128>}, {pipeline_mode = #tpu.pipeline_mode<synchronous>, transform_indices = @transform_11, window_bounds = array<i64: 128, 8>}]} {
    %c0 = arith.constant 0 : index
    %c0_0 = arith.constant 0 : index
    %0 = vector.load %arg8[%c0, %c0_0] : memref<32x8xf32, #tpu.memory_space<vmem>>, vector<32x8xf32>
    %c0_1 = arith.constant 0 : index
    %c0_2 = arith.constant 0 : index
    %1 = vector.load %arg9[%c0_1, %c0_2] : memref<1x8xf32, #tpu.memory_space<vmem>>, vector<1x8xf32>
    %c0_3 = arith.constant 0 : index
    %c0_4 = arith.constant 0 : index
    %2 = vector.load %arg2[%c0_3, %c0_4] : memref<2x1024xf32, #tpu.memory_space<vmem>>, vector<2x1024xf32>
    %c0_5 = arith.constant 0 : index
    %c0_6 = arith.constant 0 : index
    %3 = vector.load %arg4[%c0_5, %c0_6] : memref<1024x32xf32, #tpu.memory_space<vmem>>, vector<1024x32xf32>
    %c0_7 = arith.constant 0 : index
    %c0_8 = arith.constant 0 : index
    %4 = vector.load %arg5[%c0_7, %c0_8] : memref<1x32xf32, #tpu.memory_space<vmem>>, vector<1x32xf32>
    %cst = arith.constant dense<0.000000e+00> : vector<2x32xf32>
    %5 = tpu.matmul %2, %3, %cst {dimension_numbers = #tpu.dot_dimension_numbers<[1], [0], [0], [1], [0, 0, 1, 1], [], []>} : vector<2x1024xf32>, vector<1024x32xf32>, vector<2x32xf32> -> vector<2x32xf32>
    %6 = vector.broadcast %4 : vector<1x32xf32> to vector<2x32xf32>
    %7 = arith.addf %5, %6 : vector<2x32xf32>
    %cst_9 = arith.constant 0.000000e+00 : f32
    %8 = vector.broadcast %cst_9 : f32 to vector<2x32xf32>
    %9 = arith.maximumf %7, %8 : vector<2x32xf32>
    %10 = arith.mulf %9, %9 : vector<2x32xf32>
    %cst_10 = arith.constant dense<0.000000e+00> : vector<2xf32>
    %11 = vector.multi_reduction <add>, %10, %cst_10 [1] : vector<2x32xf32> to vector<2xf32>
    %12 = vector.shape_cast %11 : vector<2xf32> to vector<2x1xf32>
    %cst_11 = arith.constant 1.000000e-24 : f32
    %13 = vector.broadcast %cst_11 : f32 to vector<2x1xf32>
    %14 = arith.maximumf %12, %13 : vector<2x1xf32>
    %15 = math.rsqrt %14 : vector<2x1xf32>
    %16 = vector.broadcast %15 : vector<2x1xf32> to vector<2x32xf32>
    %17 = arith.mulf %9, %16 : vector<2x32xf32>
    %cst_12 = arith.constant dense<0.000000e+00> : vector<2x8xf32>
    %18 = tpu.matmul %17, %0, %cst_12 {dimension_numbers = #tpu.dot_dimension_numbers<[1], [0], [0], [1], [0, 0, 1, 1], [], []>} : vector<2x32xf32>, vector<32x8xf32>, vector<2x8xf32> -> vector<2x8xf32>
    %19 = vector.broadcast %1 : vector<1x8xf32> to vector<2x8xf32>
    %20 = arith.addf %18, %19 : vector<2x8xf32>
    %21 = arith.mulf %20, %20 : vector<2x8xf32>
    %cst_13 = arith.constant dense<0.000000e+00> : vector<2xf32>
    %22 = vector.multi_reduction <add>, %21, %cst_13 [1] : vector<2x8xf32> to vector<2xf32>
    %23 = vector.shape_cast %22 : vector<2xf32> to vector<2x1xf32>
    %cst_14 = arith.constant 1.000000e-24 : f32
    %24 = vector.broadcast %cst_14 : f32 to vector<2x1xf32>
    %25 = arith.maximumf %23, %24 : vector<2x1xf32>
    %26 = math.rsqrt %25 : vector<2x1xf32>
    %27 = vector.broadcast %26 : vector<2x1xf32> to vector<2x8xf32>
    %28 = arith.mulf %20, %27 : vector<2x8xf32>
    %c0_15 = arith.constant 0 : index
    %c0_16 = arith.constant 0 : index
    %29 = vector.load %arg3[%c0_15, %c0_16] : memref<2x1024xf32, #tpu.memory_space<vmem>>, vector<2x1024xf32>
    %c0_17 = arith.constant 0 : index
    %c0_18 = arith.constant 0 : index
    %30 = vector.load %arg6[%c0_17, %c0_18] : memref<1024x32xf32, #tpu.memory_space<vmem>>, vector<1024x32xf32>
    %c0_19 = arith.constant 0 : index
    %c0_20 = arith.constant 0 : index
    %31 = vector.load %arg7[%c0_19, %c0_20] : memref<1x32xf32, #tpu.memory_space<vmem>>, vector<1x32xf32>
    %cst_21 = arith.constant dense<0.000000e+00> : vector<2x32xf32>
    %32 = tpu.matmul %29, %30, %cst_21 {dimension_numbers = #tpu.dot_dimension_numbers<[1], [0], [0], [1], [0, 0, 1, 1], [], []>} : vector<2x1024xf32>, vector<1024x32xf32>, vector<2x32xf32> -> vector<2x32xf32>
    %33 = vector.broadcast %31 : vector<1x32xf32> to vector<2x32xf32>
    %34 = arith.addf %32, %33 : vector<2x32xf32>
    %cst_22 = arith.constant 0.000000e+00 : f32
    %35 = vector.broadcast %cst_22 : f32 to vector<2x32xf32>
    %36 = arith.maximumf %34, %35 : vector<2x32xf32>
    %37 = arith.mulf %36, %36 : vector<2x32xf32>
    %cst_23 = arith.constant dense<0.000000e+00> : vector<2xf32>
    %38 = vector.multi_reduction <add>, %37, %cst_23 [1] : vector<2x32xf32> to vector<2xf32>
    %39 = vector.shape_cast %38 : vector<2xf32> to vector<2x1xf32>
    %cst_24 = arith.constant 1.000000e-24 : f32
    %40 = vector.broadcast %cst_24 : f32 to vector<2x1xf32>
    %41 = arith.maximumf %39, %40 : vector<2x1xf32>
    %42 = math.rsqrt %41 : vector<2x1xf32>
    %43 = vector.broadcast %42 : vector<2x1xf32> to vector<2x32xf32>
    %44 = arith.mulf %36, %43 : vector<2x32xf32>
    %cst_25 = arith.constant dense<0.000000e+00> : vector<2x8xf32>
    %45 = tpu.matmul %44, %0, %cst_25 {dimension_numbers = #tpu.dot_dimension_numbers<[1], [0], [0], [1], [0, 0, 1, 1], [], []>} : vector<2x32xf32>, vector<32x8xf32>, vector<2x8xf32> -> vector<2x8xf32>
    %46 = vector.broadcast %1 : vector<1x8xf32> to vector<2x8xf32>
    %47 = arith.addf %45, %46 : vector<2x8xf32>
    %48 = arith.mulf %47, %47 : vector<2x8xf32>
    %cst_26 = arith.constant dense<0.000000e+00> : vector<2xf32>
    %49 = vector.multi_reduction <add>, %48, %cst_26 [1] : vector<2x8xf32> to vector<2xf32>
    %50 = vector.shape_cast %49 : vector<2xf32> to vector<2x1xf32>
    %cst_27 = arith.constant 1.000000e-24 : f32
    %51 = vector.broadcast %cst_27 : f32 to vector<2x1xf32>
    %52 = arith.maximumf %50, %51 : vector<2x1xf32>
    %53 = math.rsqrt %52 : vector<2x1xf32>
    %54 = vector.broadcast %53 : vector<2x1xf32> to vector<2x8xf32>
    %55 = arith.mulf %47, %54 : vector<2x8xf32>
    %56 = arith.mulf %28, %55 : vector<2x8xf32>
    %cst_28 = arith.constant dense<0.000000e+00> : vector<2xf32>
    %57 = vector.multi_reduction <add>, %56, %cst_28 [1] : vector<2x8xf32> to vector<2xf32>
    %58 = vector.shape_cast %57 : vector<2xf32> to vector<2x1xf32>
    %cst_29 = arith.constant 14.2857141 : f32
    %59 = vector.broadcast %cst_29 : f32 to vector<2x1xf32>
    %60 = arith.mulf %58, %59 : vector<2x1xf32>
    %c0_30 = arith.constant 0 : index
    %c0_31 = arith.constant 0 : index
    %61 = vector.load %arg11[%c0_30, %c0_31] : memref<2x1xf32, #tpu.memory_space<vmem>>, vector<2x1xf32>
    tpu.vector_store %arg11[%c0_30, %c0_31], %60 {strides = array<i32>} : memref<2x1xf32, #tpu.memory_space<vmem>>, vector<2x1xf32>,
    %c0_32 = arith.constant 0 : index
    %c0_33 = arith.constant 0 : index
    %62 = vector.load %arg10[%c0_32, %c0_33] : memref<128x8xf32, #tpu.memory_space<vmem>>, vector<128x8xf32>
    %cst_34 = arith.constant dense<0.000000e+00> : vector<2x128xf32>
    %63 = tpu.matmul %28, %62, %cst_34 {dimension_numbers = #tpu.dot_dimension_numbers<[1], [1], [0], [0], [0, 0, 1, 0], [], []>} : vector<2x8xf32>, vector<128x8xf32>, vector<2x128xf32> -> vector<2x128xf32>
    %cst_35 = arith.constant 14.2857141 : f32
    %64 = vector.broadcast %cst_35 : f32 to vector<2x128xf32>
    %65 = arith.mulf %63, %64 : vector<2x128xf32>
    %c0_36 = arith.constant 0 : index
    %c0_37 = arith.constant 0 : index
    %66 = vector.load %arg12[%c0_36, %c0_37] : memref<2x128xf32, #tpu.memory_space<vmem>>, vector<2x128xf32>
    tpu.vector_store %arg12[%c0_36, %c0_37], %65 {strides = array<i32>} : memref<2x128xf32, #tpu.memory_space<vmem>>, vector<2x128xf32>,
    %c0_38 = arith.constant 0 : index
    %67 = memref.load %arg1[%c0_38] : memref<1xi32, #tpu.memory_space<smem>>
    %c0_39 = arith.constant 0 : index
    %c0_40 = arith.constant 0 : index
    %68 = vector.load %arg10[%c0_39, %c0_40] : memref<128x8xf32, #tpu.memory_space<vmem>>, vector<128x8xf32>
    %c0_41 = arith.constant 0 : index
    %c0_42 = arith.constant 0 : index
    %69 = vector.load %arg13[%c0_41, %c0_42] : memref<128x8xf32, #tpu.memory_space<vmem>>, vector<128x8xf32>
    tpu.vector_store %arg13[%c0_41, %c0_42], %68 {strides = array<i32>} : memref<128x8xf32, #tpu.memory_space<vmem>>, vector<128x8xf32>,
    %70 = arith.index_cast %67 : i32 to index
    %c0_43 = arith.constant 0 : index
    %71 = vector.load %arg13[%70, %c0_43] : memref<128x8xf32, #tpu.memory_space<vmem>>, vector<2x8xf32>
    tpu.vector_store %arg13[%70, %c0_43], %55 {strides = array<i32>} : memref<128x8xf32, #tpu.memory_space<vmem>>, vector<2x8xf32>,
    return
  }
  func.func @transform_0(%arg0: i32, %arg1: memref<1xi32, #tpu.memory_space<smem>>) -> (i32, i32) {
    %c0_i32 = arith.constant 0 : i32
    %c0_i32_0 = arith.constant 0 : i32
    %c0_i32_1 = arith.constant 0 : i32
    return %c0_i32, %c0_i32_0 : i32, i32
  }
  func.func @transform_1(%arg0: i32, %arg1: memref<1xi32, #tpu.memory_space<smem>>) -> (i32, i32) {
    %c0_i32 = arith.constant 0 : i32
    %c0_i32_0 = arith.constant 0 : i32
    %c0_i32_1 = arith.constant 0 : i32
    return %c0_i32, %c0_i32_0 : i32, i32
  }
  func.func @transform_2(%arg0: i32, %arg1: memref<1xi32, #tpu.memory_space<smem>>) -> (i32, i32) {
    %c0_i32 = arith.constant 0 : i32
    %c0_i32_0 = arith.constant 0 : i32
    %c0_i32_1 = arith.constant 0 : i32
    return %c0_i32, %c0_i32_0 : i32, i32
  }
  func.func @transform_3(%arg0: i32, %arg1: memref<1xi32, #tpu.memory_space<smem>>) -> (i32, i32) {
    %c0_i32 = arith.constant 0 : i32
    %c0_i32_0 = arith.constant 0 : i32
    %c0_i32_1 = arith.constant 0 : i32
    return %c0_i32, %c0_i32_0 : i32, i32
  }
  func.func @transform_4(%arg0: i32, %arg1: memref<1xi32, #tpu.memory_space<smem>>) -> (i32, i32) {
    %c0_i32 = arith.constant 0 : i32
    %c0_i32_0 = arith.constant 0 : i32
    %c0_i32_1 = arith.constant 0 : i32
    return %c0_i32, %c0_i32_0 : i32, i32
  }
  func.func @transform_5(%arg0: i32, %arg1: memref<1xi32, #tpu.memory_space<smem>>) -> (i32, i32) {
    %c0_i32 = arith.constant 0 : i32
    %c0_i32_0 = arith.constant 0 : i32
    %c0_i32_1 = arith.constant 0 : i32
    return %c0_i32, %c0_i32_0 : i32, i32
  }
  func.func @transform_6(%arg0: i32, %arg1: memref<1xi32, #tpu.memory_space<smem>>) -> (i32, i32) {
    %c0_i32 = arith.constant 0 : i32
    %c0_i32_0 = arith.constant 0 : i32
    %c0_i32_1 = arith.constant 0 : i32
    return %c0_i32, %c0_i32_0 : i32, i32
  }
  func.func @transform_7(%arg0: i32, %arg1: memref<1xi32, #tpu.memory_space<smem>>) -> (i32, i32) {
    %c0_i32 = arith.constant 0 : i32
    %c0_i32_0 = arith.constant 0 : i32
    %c0_i32_1 = arith.constant 0 : i32
    return %c0_i32, %c0_i32_0 : i32, i32
  }
  func.func @transform_8(%arg0: i32, %arg1: memref<1xi32, #tpu.memory_space<smem>>) -> (i32, i32) {
    %c0_i32 = arith.constant 0 : i32
    %c0_i32_0 = arith.constant 0 : i32
    %c0_i32_1 = arith.constant 0 : i32
    return %c0_i32, %c0_i32_0 : i32, i32
  }
  func.func @transform_9(%arg0: i32, %arg1: memref<1xi32, #tpu.memory_space<smem>>) -> (i32, i32) {
    %c0_i32 = arith.constant 0 : i32
    %c0_i32_0 = arith.constant 0 : i32
    %c0_i32_1 = arith.constant 0 : i32
    return %c0_i32, %c0_i32_0 : i32, i32
  }
  func.func @transform_10(%arg0: i32, %arg1: memref<1xi32, #tpu.memory_space<smem>>) -> (i32, i32) {
    %c0_i32 = arith.constant 0 : i32
    %c0_i32_0 = arith.constant 0 : i32
    %c0_i32_1 = arith.constant 0 : i32
    return %c0_i32, %c0_i32_0 : i32, i32
  }
  func.func @transform_11(%arg0: i32, %arg1: memref<1xi32, #tpu.memory_space<smem>>) -> (i32, i32) {
    %c0_i32 = arith.constant 0 : i32
    %c0_i32_0 = arith.constant 0 : i32
    %c0_i32_1 = arith.constant 0 : i32
    return %c0_i32, %c0_i32_0 : i32, i32
  }
}

</mosaic_0001>

<bundles_post_ra>
// kernel: moco_forward.1
= control target key start
LH: loop header
LB: loop body
LE: loop exit
PB: predicated region body
PF: predicated region fallthrough
CT: control target
= control target key end

     0   :  { %v185_v0 = vlaneseq  ;;  %v2046_v4 = vmov 1983009808   ;;  %vm505_vm0 = vcmask 254976   ;;  %vm2048_vm1 = vmmov 0   ;;  %s3163_s3 = inlined_call_operand.vmem [shape: f32[1024,32], index: 3, kind: input, shape index: {}]   ;;  %s3164_s1 = inlined_call_operand.vmem [shape: f32[2,1024], index: 1, kind: input, shape index: {}]   ;;  %s3165_s5 = inlined_call_operand.vmem [shape: f32[1024,32], index: 5, kind: input, shape index: {}]   ;;  %s3166_s4 = inlined_call_operand.vmem [shape: f32[1,32], index: 4, kind: input, shape index: {}]   ;;  %s3167_s7 = inlined_call_operand.vmem [shape: f32[32,8], index: 7, kind: input, shape index: {}]   ;;  %s3168_s2 = inlined_call_operand.vmem [shape: f32[2,1024], index: 2, kind: input, shape index: {}]   ;;  %s3169_s9 = inlined_call_operand.vmem [shape: f32[128,8], index: 9, kind: input, shape index: {}, may-alias: {9,12}]   ;;  %s3170_s12 = inlined_call_operand.vmem [shape: f32[128,8], index: 12, kind: output, shape index: {2}, may-alias: {9,12}]   ;;  %s3171_s8 = inlined_call_operand.vmem [shape: f32[1,8], index: 8, kind: input, shape index: {}]   ;;  %s3172_s6 = inlined_call_operand.vmem [shape: f32[1,32], index: 6, kind: input, shape index: {}]   ;;  %s3173_s11 = inlined_call_operand.vmem [shape: f32[2,128], index: 11, kind: output, shape index: {1}]   ;;  %s3174_s0 = inlined_call_operand.<no memory space> [shape: s32[1], index: 0, kind: input, shape index: {}]   ;;  %s3175_s10 = inlined_call_operand.vmem [shape: f32[2,1], index: 10, kind: output, shape index: {0}]  }
   0x1   :  { %v60_v1 = vld [vmem:[%s3163_s3 + $0x80] sm:$0xff]  ;;  %v61_v2 = vld [vmem:[%s3163_s3 + $0x88] sm:$0xff]  ;;  %v183_v5 = vunpack.c.l.s4 %v2046_v4  ;;  %v62_v8 = vld [vmem:[%s3163_s3 + $0x90] sm:$0xff]  ;;  %vm518_vm2 = vcmask 261120   ;;  %vm1172_vm3 = vcmask 64512   ;;  %vm593_vm5 = vcmask 58368   ;;  %s1329_s25 = scalar_lea.vmem %s3170_s12, %s3174_s0 }
   0x2   :  { %v44_v3 = vld [vmem:[%s3163_s3] sm:$0xff]  ;;  %v1730_v6 = vpack.c.bf16 %v61_v2, %v60_v1  ;;  %v45_v7 = vld [vmem:[%s3163_s3 + $0x8] sm:$0xff]  ;;  %v63_v9 = vld [vmem:[%s3163_s3 + $0x98] sm:$0xff]  ;;  %v186_v17 = vshrl.u32 %v185_v0, 7  ;;  %vm1154_vm6 = vcmask 1024  }
   0x3   :  { %v1732_v10 = vpack.c.bf16 %v45_v7, %v44_v3  ;;  %v1734_v11 = vpack.c.bf16 %v63_v9, %v62_v8  ;;  %v46_v12 = vld [vmem:[%s3163_s3 + $0x10] sm:$0xff]  ;;  %v47_v13 = vld [vmem:[%s3163_s3 + $0x18] sm:$0xff]  ;;  %v64_v14 = vld [vmem:[%s3163_s3 + $0xa0] sm:$0xff]  ;;  %v184_v16 = vunpack.c.0.s8 %v183_v5 }
   0x4   :  { %1731 = vmatprep.subr.bf16.mxu1 %v1730_v6  ;;  %v65_v15 = vld [vmem:[%s3163_s3 + $0xa8] sm:$0xff]  ;;  %v1736_v18 = vpack.c.bf16 %v47_v13, %v46_v12  ;;  %v48_v20 = vld [vmem:[%s3163_s3 + $0x20] sm:$0xff]  ;;  %v66_v22 = vld [vmem:[%s3163_s3 + $0xb0] sm:$0xff] }
   0x5   :  { %1733 = vmatpush3.bf16.msra.mxu1 %v1732_v10  ;;  %v1738_v19 = vpack.c.bf16 %v65_v15, %v64_v14  ;;  %v49_v21 = vld [vmem:[%s3163_s3 + $0x28] sm:$0xff]  ;;  %v67_v23 = vld [vmem:[%s3163_s3 + $0xb8] sm:$0xff]  ;;  %v2157_v24 = vsub.s32 %v184_v16, %v186_v17  ;;  %v50_v27 = vld [vmem:[%s3163_s3 + $0x30] sm:$0xff] }
   0x6   :  { %1735 = vmatprep.subr.bf16.mxu1 %v1734_v11  ;;  %v1740_v25 = vpack.c.bf16 %v49_v21, %v48_v20  ;;  %v1742_v26 = vpack.c.bf16 %v67_v23, %v66_v22  ;;  %v51_v28 = vld [vmem:[%s3163_s3 + $0x38] sm:$0xff]  ;;  %v68_v29 = vld [vmem:[%s3163_s3 + $0xc0] sm:$0xff]  ;;  %v69_v30 = vld [vmem:[%s3163_s3 + $0xc8] sm:$0xff] }
   0x7   :  { %v2174_v31 = vld [vmem:[%s3164_s1] sm:$0xff]  ;;  %v1744_v33 = vpack.c.bf16 %v51_v28, %v50_v27  ;;  %v125_v36 = vld [vmem:[%s3163_s3 + $0x288] sm:$0xff]  ;;  %v1746_v37 = vpack.c.bf16 %v69_v30, %v68_v29  ;;  %v70_v43 = vld [vmem:[%s3163_s3 + $0xd0] sm:$0xff] }
   0x8   :  { %v2178_v32 = vrot.slane %v2174_v31, %v2157_v24  ;;  %v52_v34 = vld [vmem:[%s3163_s3 + $0x40] sm:$0xff]  ;;  %v53_v38 = vld [vmem:[%s3163_s3 + $0x48] sm:$0xff]  ;;  %v71_v44 = vld [vmem:[%s3163_s3 + $0xd8] sm:$0xff]  ;;  %v181_v22 = vcombine.high %v2174_v31, %v2174_v31 }
   0x9   :  { %1737 = vmatpush3.bf16.msra.mxu1 %v1736_v18  ;;  %v124_v35 = vld [vmem:[%s3163_s3 + $0x280] sm:$0xff]  ;;  %v109_v42 = vld [vmem:[%s3163_s3 + $0x208] sm:$0xff]  ;;  %v126_v46 = vld [vmem:[%s3163_s3 + $0x290] sm:$0xff]  ;;  %v1748_v49 = vpack.c.bf16 %v53_v38, %v52_v34  ;;  %v1750_v54 = vpack.c.bf16 %v71_v44, %v70_v43 }
   0xa   :  { %1739 = vmatprep.subr.bf16.mxu1 %v1738_v19  ;;  %v196_v39 = vcombine.high %v2178_v32, %v2178_v32  ;;  %v1794_v40 = vpack.c.bf16 %v125_v36, %v124_v35  ;;  %v108_v41 = vld [vmem:[%s3163_s3 + $0x200] sm:$0xff]  ;;  %v127_v47 = vld [vmem:[%s3163_s3 + $0x298] sm:$0xff]  ;;  %v110_v48 = vld [vmem:[%s3163_s3 + $0x210] sm:$0xff] }
   0xb   :  { %v1796_v45 = vpack.c.bf16 %v109_v42, %v108_v41  ;;  %v54_v50 = vld [vmem:[%s3163_s3 + $0x50] sm:$0xff]  ;;  %v55_v51 = vld [vmem:[%s3163_s3 + $0x58] sm:$0xff]  ;;  %v1798_v52 = vpack.c.bf16 %v127_v47, %v126_v46  ;;  %v72_v55 = vld [vmem:[%s3163_s3 + $0xe0] sm:$0xff] }
   0xc   :  { %287 = vmatprep.mubr.f32.mxu1 %v196_v39  ;;  %1795 = vmatprep.subr.bf16.mxu0 %v1794_v40  ;;  %v111_v53 = vld [vmem:[%s3163_s3 + $0x218] sm:$0xff]  ;;  %v73_v56 = vld [vmem:[%s3163_s3 + $0xe8] sm:$0xff]  ;;  %v128_v58 = vld [vmem:[%s3163_s3 + $0x2a0] sm:$0xff]  ;;  %v1752_v63 = vpack.c.bf16 %v55_v51, %v54_v50  ;;  %v2323_v40 = vrot.slane %v181_v22, %v2157_v24 }
   0xd   :  { %1741 = vmatpush3.bf16.msra.mxu1 %v1740_v25  ;;  %1797 = vmatpush3.bf16.msra.mxu0 %v1796_v45  ;;  %v1800_v57 = vpack.c.bf16 %v111_v53, %v110_v48  ;;  %v129_v59 = vld [vmem:[%s3163_s3 + $0x2a8] sm:$0xff]  ;;  %v112_v60 = vld [vmem:[%s3163_s3 + $0x220] sm:$0xff]  ;;  %v130_v2 = vld [vmem:[%s3163_s3 + $0x2b0] sm:$0xff]  ;;  %v1754_v4 = vpack.c.bf16 %v73_v56, %v72_v55 }
   0xe   :  { %1743 = vmatprep.subr.bf16.mxu1 %v1742_v26  ;;  %1799 = vmatprep.subr.bf16.mxu0 %v1798_v52  ;;  %v113_v61 = vld [vmem:[%s3163_s3 + $0x228] sm:$0xff]  ;;  %v1802_v62 = vpack.c.bf16 %v129_v59, %v128_v58  ;;  %v56_v0 = vld [vmem:[%s3163_s3 + $0x60] sm:$0xff]  ;;  %v131_v3 = vld [vmem:[%s3163_s3 + $0x2b8] sm:$0xff] }
   0xf   :  { %v1804_v1 = vpack.c.bf16 %v113_v61, %v112_v60  ;;  %v57_v5 = vld [vmem:[%s3163_s3 + $0x68] sm:$0xff]  ;;  %v1806_v6 = vpack.c.bf16 %v131_v3, %v130_v2  ;;  %v114_v7 = vld [vmem:[%s3163_s3 + $0x230] sm:$0xff]  ;;  %v115_v8 = vld [vmem:[%s3163_s3 + $0x238] sm:$0xff] }
  0x10   :  { %v74_v9 = vld [vmem:[%s3163_s3 + $0xf0] sm:$0xff]  ;;  %v75_v10 = vld [vmem:[%s3163_s3 + $0xf8] sm:$0xff]  ;;  %v132_v11 = vld [vmem:[%s3163_s3 + $0x2c0] sm:$0xff]  ;;  %v1756_v13 = vpack.c.bf16 %v57_v5, %v56_v0  ;;  %v1808_v16 = vpack.c.bf16 %v115_v8, %v114_v7 }
  0x11   :  { %1745 = vmatpush3.bf16.msra.mxu1 %v1744_v33  ;;  %1801 = vmatpush3.bf16.msra.mxu0 %v1800_v57  ;;  %v133_v12 = vld [vmem:[%s3163_s3 + $0x2c8] sm:$0xff]  ;;  %v58_v14 = vld [vmem:[%s3163_s3 + $0x70] sm:$0xff]  ;;  %v59_v15 = vld [vmem:[%s3163_s3 + $0x78] sm:$0xff]  ;;  %v1758_v17 = vpack.c.bf16 %v75_v10, %v74_v9 }
  0x12   :  { %1747 = vmatprep.subr.bf16.mxu1 %v1746_v37  ;;  %1803 = vmatprep.subr.bf16.mxu0 %v1802_v62  ;;  %v92_v18 = vld [vmem:[%s3163_s3 + $0x180] sm:$0xff]  ;;  %v1810_v19 = vpack.c.bf16 %v133_v12, %v132_v11  ;;  %v117_v21 = vld [vmem:[%s3163_s3 + $0x248] sm:$0xff]  ;;  %v134_v25 = vld [vmem:[%s3163_s3 + $0x2d0] sm:$0xff]  ;;  %v1760_v27 = vpack.c.bf16 %v59_v15, %v58_v14 }
  0x13   :  { %v116_v20 = vld [vmem:[%s3163_s3 + $0x240] sm:$0xff]  ;;  %v93_v23 = vld [vmem:[%s3163_s3 + $0x188] sm:$0xff]  ;;  %v135_v26 = vld [vmem:[%s3163_s3 + $0x2d8] sm:$0xff] }
  0x14   :  { %v76_v28 = vld [vmem:[%s3163_s3 + $0x100] sm:$0xff]  ;;  %v77_v29 = vld [vmem:[%s3163_s3 + $0x108] sm:$0xff]  ;;  %v1812_v30 = vpack.c.bf16 %v117_v21, %v116_v20  ;;  %v1762_v31 = vpack.c.bf16 %v93_v23, %v92_v18  ;;  %v94_v33 = vld [vmem:[%s3163_s3 + $0x190] sm:$0xff]  ;;  %v1814_v34 = vpack.c.bf16 %v135_v26, %v134_v25 }
  0x15   :  { %1749 = vmatpush3.bf16.msra.mxu1 %v1748_v49  ;;  %1805 = vmatpush3.bf16.msra.mxu0 %v1804_v1  ;;  %v118_v35 = vld [vmem:[%s3163_s3 + $0x250] sm:$0xff]  ;;  %v119_v36 = vld [vmem:[%s3163_s3 + $0x258] sm:$0xff]  ;;  %v136_v38 = vld [vmem:[%s3163_s3 + $0x2e0] sm:$0xff]  ;;  %v1764_v41 = vpack.c.bf16 %v77_v29, %v76_v28 }
  0x16   :  { %1751 = vmatprep.subr.bf16.mxu1 %v1750_v54  ;;  %1807 = vmatprep.subr.bf16.mxu0 %v1806_v6  ;;  %v95_v37 = vld [vmem:[%s3163_s3 + $0x198] sm:$0xff]  ;;  %v137_v39 = vld [vmem:[%s3163_s3 + $0x2e8] sm:$0xff]  ;;  %v78_v42 = vld [vmem:[%s3163_s3 + $0x110] sm:$0xff]  ;;  %v1816_v45 = vpack.c.bf16 %v119_v36, %v118_v35  ;;  %v197_v54 = vcombine.high %v2323_v40, %v2323_v40 }
  0x17   :  { %v79_v43 = vld [vmem:[%s3163_s3 + $0x118] sm:$0xff]  ;;  %v96_v44 = vld [vmem:[%s3163_s3 + $0x1a0] sm:$0xff]  ;;  %v1766_v46 = vpack.c.bf16 %v95_v37, %v94_v33  ;;  %v1818_v47 = vpack.c.bf16 %v137_v39, %v136_v38  ;;  %v121_v49 = vld [vmem:[%s3163_s3 + $0x268] sm:$0xff] }
  0x18   :  { %v120_v48 = vld [vmem:[%s3163_s3 + $0x260] sm:$0xff]  ;;  %v2343_v50 = vld [vmem:[%s3164_s1 + $0x8] sm:$0xff]  ;;  %v138_v52 = vld [vmem:[%s3163_s3 + $0x2f0] sm:$0xff]  ;;  %v1768_v56 = vpack.c.bf16 %v79_v43, %v78_v42 }
  0x19   :  { %1753 = vmatpush3.bf16.msra.mxu1 %v1752_v63  ;;  %1809 = vmatpush3.bf16.msra.mxu0 %v1808_v16  ;;  %v97_v51 = vld [vmem:[%s3163_s3 + $0x1a8] sm:$0xff]  ;;  %v139_v53 = vld [vmem:[%s3163_s3 + $0x2f8] sm:$0xff]  ;;  %v205_v55 = vrot.slane %v2343_v50, %v2157_v24  ;;  %v80_v57 = vld [vmem:[%s3163_s3 + $0x120] sm:$0xff]  ;;  %v1820_v58 = vpack.c.bf16 %v121_v49, %v120_v48  ;;  %v198_v29 = vcombine.high %v2343_v50, %v2343_v50 }
  0x1a   :  { %1755 = vmatprep.subr.bf16.mxu1 %v1754_v4  ;;  %1811 = vmatprep.subr.bf16.mxu0 %v1810_v19  ;;  %v1770_v60 = vpack.c.bf16 %v97_v51, %v96_v44  ;;  %v81_v61 = vld [vmem:[%s3163_s3 + $0x128] sm:$0xff]  ;;  %v1822_v62 = vpack.c.bf16 %v139_v53, %v138_v52  ;;  %v123_v63 = vld [vmem:[%s3163_s3 + $0x278] sm:$0xff]  ;;  %v98_v0 = vld [vmem:[%s3163_s3 + $0x1b0] sm:$0xff] }
  0x1b   :  { %v213_v59 = vcombine.high %v205_v55, %v205_v55  ;;  %v99_v1 = vld [vmem:[%s3163_s3 + $0x1b8] sm:$0xff]  ;;  %v1772_v2 = vpack.c.bf16 %v81_v61, %v80_v57  ;;  %v82_v5 = vld [vmem:[%s3163_s3 + $0x130] sm:$0xff]  ;;  %v100_v7 = vld [vmem:[%s3163_s3 + $0x1c0] sm:$0xff]  ;;  %v2440_v37 = vrot.slane %v198_v29, %v2157_v24 }
  0x1c   :  { %v1774_v4 = vpack.c.bf16 %v99_v1, %v98_v0  ;;  %v83_v6 = vld [vmem:[%s3163_s3 + $0x138] sm:$0xff]  ;;  %v101_v8 = vld [vmem:[%s3163_s3 + $0x1c8] sm:$0xff]  ;;  %v84_v11 = vld [vmem:[%s3163_s3 + $0x140] sm:$0xff] }
  0x1d   :  { %1757 = vmatpush3.bf16.msra.mxu1 %v1756_v13  ;;  %1813 = vmatpush3.bf16.msra.mxu0 %v1812_v30  ;;  %v1776_v9 = vpack.c.bf16 %v83_v6, %v82_v5  ;;  %v1778_v10 = vpack.c.bf16 %v101_v8, %v100_v7  ;;  %v85_v12 = vld [vmem:[%s3163_s3 + $0x148] sm:$0xff]  ;;  %v102_v13 = vld [vmem:[%s3163_s3 + $0x1d0] sm:$0xff]  ;;  %v103_v14 = vld [vmem:[%s3163_s3 + $0x1d8] sm:$0xff] }
  0x1e   :  { %1759 = vmatprep.subr.bf16.mxu1 %v1758_v17  ;;  %1815 = vmatprep.subr.bf16.mxu0 %v1814_v34  ;;  %v1780_v15 = vpack.c.bf16 %v85_v12, %v84_v11  ;;  %v1782_v16 = vpack.c.bf16 %v103_v14, %v102_v13  ;;  %v86_v17 = vld [vmem:[%s3163_s3 + $0x150] sm:$0xff]  ;;  %v87_v18 = vld [vmem:[%s3163_s3 + $0x158] sm:$0xff]  ;;  %v104_v19 = vld [vmem:[%s3163_s3 + $0x1e0] sm:$0xff] }
  0x1f   :  { %427 = vmatprep.mubr.f32.mxu0 %v213_v59  ;;  %v105_v20 = vld [vmem:[%s3163_s3 + $0x1e8] sm:$0xff]  ;;  %v1784_v21 = vpack.c.bf16 %v87_v18, %v86_v17  ;;  %v88_v23 = vld [vmem:[%s3163_s3 + $0x160] sm:$0xff]  ;;  %v106_v26 = vld [vmem:[%s3163_s3 + $0x1f0] sm:$0xff] }
  0x20   :  { %v1786_v22 = vpack.c.bf16 %v105_v20, %v104_v19  ;;  %v89_v25 = vld [vmem:[%s3163_s3 + $0x168] sm:$0xff]  ;;  %v91_v33 = vld [vmem:[%s3163_s3 + $0x178] sm:$0xff]  ;;  %v156_v34 = vld [vmem:[%s3163_s3 + $0x380] sm:$0xff] }
  0x21   :  { %1761 = vmatpush3.bf16.msra.mxu1 %v1760_v27  ;;  %1817 = vmatpush3.bf16.msra.mxu0 %v1816_v45  ;;  %v107_v27 = vld [vmem:[%s3163_s3 + $0x1f8] sm:$0xff]  ;;  %v1788_v28 = vpack.c.bf16 %v89_v25, %v88_v23  ;;  %v157_v35 = vld [vmem:[%s3163_s3 + $0x388] sm:$0xff]  ;;  %v140_v39 = vld [vmem:[%s3163_s3 + $0x300] sm:$0xff]  ;;  %v214_v45 = vcombine.high %v2440_v37, %v2440_v37 }
  0x22   :  { %1763 = vmatprep.subr.bf16.mxu1 %v1762_v31  ;;  %1819 = vmatprep.subr.bf16.mxu0 %v1818_v47  ;;  %v1790_v30 = vpack.c.bf16 %v107_v27, %v106_v26  ;;  %v90_v31 = vld [vmem:[%s3163_s3 + $0x170] sm:$0xff]  ;;  %v1826_v38 = vpack.c.bf16 %v157_v35, %v156_v34  ;;  %v159_v43 = vld [vmem:[%s3163_s3 + $0x398] sm:$0xff]  ;;  %v160_v49 = vld [vmem:[%s3163_s3 + $0x3a0] sm:$0xff] }
  0x23   :  { %v1792_v36 = vpack.c.bf16 %v91_v33, %v90_v31  ;;  %v158_v42 = vld [vmem:[%s3163_s3 + $0x390] sm:$0xff]  ;;  %v143_v48 = vld [vmem:[%s3163_s3 + $0x318] sm:$0xff]  ;;  %v161_v50 = vld [vmem:[%s3163_s3 + $0x3a8] sm:$0xff] }
  0x24   :  { %288 = vmatmul.mubr.f32.vlgmr.msra.gmra.mrb[0].mxu1 %v2178_v32  ;;  %v122_v32 = vld [vmem:[%s3163_s3 + $0x270] sm:$0xff]  ;;  %v1834_v52 = vpack.c.bf16 %v161_v50, %v160_v49  ;;  %v144_v53 = vld [vmem:[%s3163_s3 + $0x320] sm:$0xff]  ;;  %v147_v59 = vld [vmem:[%s3163_s3 + $0x338] sm:$0xff] }
  0x25   :  { %1765 = vmatpush3.bf16.msra.mxu1 %v1764_v41  ;;  %357 = vmatprep.mubr.f32.mxu1 %v197_v54  ;;  %v1824_v3 = vpack.c.bf16 %v123_v63, %v122_v32  ;;  %v141_v41 = vld [vmem:[%s3163_s3 + $0x308] sm:$0xff]  ;;  %v142_v47 = vld [vmem:[%s3163_s3 + $0x310] sm:$0xff]  ;;  %v148_v63 = vld [vmem:[%s3163_s3 + $0x340] sm:$0xff] }
  0x26   :  { %1767 = vmatprep.subr.bf16.mxu1 %v1766_v46  ;;  %1821 = vmatpush3.bf16.msra.mxu0 %v1820_v58  ;;  %v1828_v44 = vpack.c.bf16 %v141_v41, %v140_v39  ;;  %v1830_v46 = vpack.c.bf16 %v159_v43, %v158_v42  ;;  %v1832_v51 = vpack.c.bf16 %v143_v48, %v142_v47  ;;  %v145_v54 = vld [vmem:[%s3163_s3 + $0x328] sm:$0xff]  ;;  %v146_v58 = vld [vmem:[%s3163_s3 + $0x330] sm:$0xff]  ;;  %v151_v6 = vld [vmem:[%s3163_s3 + $0x358] sm:$0xff] }
  0x27   :  { %1823 = vmatprep.subr.bf16.mxu0 %v1822_v62  ;;  %v165_v61 = vld [vmem:[%s3163_s3 + $0x3c8] sm:$0xff]  ;;  %v1840_v62 = vpack.c.bf16 %v147_v59, %v146_v58  ;;  %v166_v1 = vld [vmem:[%s3163_s3 + $0x3d0] sm:$0xff]  ;;  %v168_v7 = vld [vmem:[%s3163_s3 + $0x3e0] sm:$0xff] }
  0x28   :  { %v149_v0 = vld [vmem:[%s3163_s3 + $0x348] sm:$0xff]  ;;  %v150_v5 = vld [vmem:[%s3163_s3 + $0x350] sm:$0xff]  ;;  %v152_v11 = vld [vmem:[%s3163_s3 + $0x360] sm:$0xff] }
  0x29   :  { %1769 = vmatpush3.bf16.msra.mxu1 %v1768_v56  ;;  %v1836_v56 = vpack.c.bf16 %v145_v54, %v144_v53  ;;  %v169_v8 = vld [vmem:[%s3163_s3 + $0x3e8] sm:$0xff]  ;;  %v170_v13 = vld [vmem:[%s3163_s3 + $0x3f0] sm:$0xff]  ;;  %v171_v14 = vld [vmem:[%s3163_s3 + $0x3f8] sm:$0xff] }
  0x2a   :  { %1771 = vmatprep.subr.bf16.mxu1 %v1770_v60  ;;  %1825 = vmatpush3.bf16.msra.mxu0 %v1824_v3  ;;  %v164_v60 = vld [vmem:[%s3163_s3 + $0x3c0] sm:$0xff]  ;;  %v1844_v3 = vpack.c.bf16 %v149_v0, %v148_v63  ;;  %v153_v12 = vld [vmem:[%s3163_s3 + $0x368] sm:$0xff]  ;;  %v154_v17 = vld [vmem:[%s3163_s3 + $0x370] sm:$0xff] }
  0x2b   :  { %v1842_v32 = vpack.c.bf16 %v165_v61, %v164_v60  ;;  %v155_v18 = vld [vmem:[%s3163_s3 + $0x378] sm:$0xff]  ;;  %v618_v20 = vld [vmem:[%s3165_s5 + $0x80] sm:$0xff]  ;;  %v603_v25 = vld [vmem:[%s3165_s5 + $0x8] sm:$0xff] }
  0x2c   :  { %v1856_v19 = vpack.c.bf16 %v155_v18, %v154_v17  ;;  %v620_v26 = vld [vmem:[%s3165_s5 + $0x90] sm:$0xff]  ;;  %v621_v27 = vld [vmem:[%s3165_s5 + $0x98] sm:$0xff]  ;;  %v622_v33 = vld [vmem:[%s3165_s5 + $0xa0] sm:$0xff]  ;;  %v2049_v18 = vmov 0.0  }
  0x2d   :  { %1773 = vmatpush3.bf16.msra.mxu1 %v1772_v2  ;;  %428 = vmatmul.mubr.f32.vlgmr.msra.gmra.mrb[0].mxu0 %v205_v55  ;;  %v162_v55 = vld [vmem:[%s3163_s3 + $0x3b0] sm:$0xff]  ;;  %v167_v2 = vld [vmem:[%s3163_s3 + $0x3d8] sm:$0xff]  ;;  %v1868_v29 = vpack.c.bf16 %v621_v27, %v620_v26  ;;  %v623_v34 = vld [vmem:[%s3165_s5 + $0xa8] sm:$0xff] }
  0x2e   :  { %1775 = vmatprep.subr.bf16.mxu1 %v1774_v4  ;;  %v1846_v4 = vpack.c.bf16 %v167_v2, %v166_v1  ;;  %v605_v31 = vld [vmem:[%s3165_s5 + $0x18] sm:$0xff]  ;;  %v624_v39 = vld [vmem:[%s3165_s5 + $0xb0] sm:$0xff]  ;;  %v1344_v53 = vld [vmem:[%s3166_s4] ss:$0 sm:$0xff]  ;;  %1681 = vmatprep.mubr.msk.f32.mxu0 %vm2048_vm1, %v2049_v18 }
  0x2f   :  { %v625_v41 = vld [vmem:[%s3165_s5 + $0xb8] sm:$0xff]  ;;  %v626_v1 = vld [vmem:[%s3165_s5 + $0xc0] sm:$0xff]  ;;  %v627_v2 = vld [vmem:[%s3165_s5 + $0xc8] sm:$0xff] }
  0x30   :  { %v1876_v43 = vpack.c.bf16 %v625_v41, %v624_v39  ;;  %v631_v17 = vld [vmem:[%s3165_s5 + $0xe8] sm:$0xff]  ;;  %v40_v26 = vld [vmem:[%s3167_s7 + $0x18] sm:$0xff]  ;;  %v632_v27 = vld [vmem:[%s3165_s5 + $0xf0] sm:$0xff] }
  0x31   :  { %1777 = vmatpush3.bf16.msra.mxu1 %v1776_v9  ;;  %v1848_v9 = vpack.c.bf16 %v151_v6, %v150_v5  ;;  %v611_v5 = vld [vmem:[%s3165_s5 + $0x48] sm:$0xff]  ;;  %v682_v41 = vld [vmem:[%s3165_s5 + $0x280] sm:$0xff]  ;;  %vm3003_vm4 = vmpackc.low %vm1172_vm3, %vm1172_vm3 }
  0x32   :  { %1779 = vmatprep.subr.bf16.mxu1 %v1778_v10  ;;  %v1850_v10 = vpack.c.bf16 %v169_v8, %v168_v7  ;;  %v628_v7 = vld [vmem:[%s3165_s5 + $0xd0] sm:$0xff]  ;;  %v629_v8 = vld [vmem:[%s3165_s5 + $0xd8] sm:$0xff] }
  0x35   :  { %1781 = vmatpush3.bf16.msra.mxu1 %v1780_v15  ;;  %v1852_v15 = vpack.c.bf16 %v153_v12, %v152_v11  ;;  %v613_v11 = vld [vmem:[%s3165_s5 + $0x58] sm:$0xff]  ;;  %v630_v12 = vld [vmem:[%s3165_s5 + $0xe0] sm:$0xff] }
  0x36   :  { %1783 = vmatprep.subr.bf16.mxu1 %v1782_v16  ;;  %v1854_v16 = vpack.c.bf16 %v171_v14, %v170_v13  ;;  %v2047_v14 = vmov 0.0|0.0  }
  0x37   :  { %1858 = vmatprep.subr.bf16.mxu0 %v2047_v14 }
  0x39   :  { %1785 = vmatpush3.bf16.msra.mxu1 %v1784_v21  ;;  %v619_v21 = vld [vmem:[%s3165_s5 + $0x88] sm:$0xff] }
  0x3a   :  { %1787 = vmatprep.subr.bf16.mxu1 %v1786_v22  ;;  %v602_v22 = vld [vmem:[%s3165_s5] sm:$0xff]  ;;  %v1864_v23 = vpack.c.bf16 %v619_v21, %v618_v20  ;;  %v1888_v20 = vpack.c.bf16 %v631_v17, %v630_v12 }
  0x3b   :  { %v614_v21 = vld [vmem:[%s3165_s5 + $0x60] sm:$0xff] }
  0x3c   :  { %v678_v17 = vld [vmem:[%s3165_s5 + $0x260] sm:$0xff] }
  0x3d   :  { %1789 = vmatpush3.bf16.msra.mxu1 %v1788_v28  ;;  %v1866_v28 = vpack.c.bf16 %v603_v25, %v602_v22  ;;  %v615_v22 = vld [vmem:[%s3165_s5 + $0x68] sm:$0xff] }
  0x3e   :  { %1791 = vmatprep.subr.bf16.mxu1 %v1790_v30  ;;  %v604_v30 = vld [vmem:[%s3165_s5 + $0x10] sm:$0xff]  ;;  %v1890_v25 = vpack.c.bf16 %v615_v22, %v614_v21 }
  0x3f   :  { %v1870_v35 = vpack.c.bf16 %v605_v31, %v604_v30  ;;  %v616_v31 = vld [vmem:[%s3165_s5 + $0x70] sm:$0xff] }
  0x40   :  { %v696_v22 = vld [vmem:[%s3165_s5 + $0x2f0] sm:$0xff] }
  0x41   :  { %1793 = vmatpush3.bf16.msra.mxu1 %v1792_v36  ;;  %v1872_v36 = vpack.c.bf16 %v623_v34, %v622_v33  ;;  %v617_v33 = vld [vmem:[%s3165_s5 + $0x78] sm:$0xff]  ;;  %v650_v34 = vld [vmem:[%s3165_s5 + $0x180] sm:$0xff] }
  0x42   :  { %1827 = vmatprep.subr.bf16.mxu1 %v1826_v38  ;;  %v607_v38 = vld [vmem:[%s3165_s5 + $0x28] sm:$0xff] }
  0x44   :  { %358 = vmatmul.mubr.f32.vlgmr.msra.gmra.mrb[2].mxu1 %v2323_v40  ;;  %v163_v40 = vld [vmem:[%s3163_s3 + $0x3b8] sm:$0xff] }
  0x45   :  { %1829 = vmatpush3.bf16.msra.mxu1 %v1828_v44  ;;  %497 = vmatprep.mubr.f32.mxu1 %v214_v45  ;;  %v1838_v57 = vpack.c.bf16 %v163_v40, %v162_v55  ;;  %v608_v44 = vld [vmem:[%s3165_s5 + $0x30] sm:$0xff]  ;;  %v609_v45 = vld [vmem:[%s3165_s5 + $0x38] sm:$0xff] }
  0x46   :  { %1831 = vmatprep.subr.bf16.mxu1 %v1830_v46  ;;  %v1878_v46 = vpack.c.bf16 %v609_v45, %v608_v44  ;;  %v666_v45 = vld [vmem:[%s3165_s5 + $0x200] sm:$0xff] }
  0x49   :  { %1833 = vmatpush3.bf16.msra.mxu1 %v1832_v51 }
  0x4a   :  { %1835 = vmatprep.subr.bf16.mxu1 %v1834_v52 }
  0x4d   :  { %1837 = vmatpush3.bf16.msra.mxu1 %v1836_v56 }
  0x4e   :  { %1839 = vmatprep.subr.bf16.mxu1 %v1838_v57 }
  0x51   :  { %1841 = vmatpush3.bf16.msra.mxu1 %v1840_v62 }
  0x52   :  { %1843 = vmatprep.subr.bf16.mxu1 %v1842_v32 }
  0x55   :  { %1845 = vmatpush3.bf16.msra.mxu1 %v1844_v3  ;;  %v1880_v3 = vpack.c.bf16 %v627_v2, %v626_v1  ;;  %v690_v1 = vld [vmem:[%s3165_s5 + $0x2c0] sm:$0xff]  ;;  %v691_v2 = vld [vmem:[%s3165_s5 + $0x2c8] sm:$0xff] }
  0x56   :  { %1847 = vmatprep.subr.bf16.mxu1 %v1846_v4  ;;  %v610_v4 = vld [vmem:[%s3165_s5 + $0x40] sm:$0xff] }
  0x57   :  { %v1882_v6 = vpack.c.bf16 %v611_v5, %v610_v4  ;;  %v674_v4 = vld [vmem:[%s3165_s5 + $0x240] sm:$0xff]  ;;  %v675_v5 = vld [vmem:[%s3165_s5 + $0x248] sm:$0xff] }
  0x59   :  { %1849 = vmatpush3.bf16.msra.mxu1 %v1848_v9  ;;  %v1884_v9 = vpack.c.bf16 %v629_v8, %v628_v7  ;;  %v692_v7 = vld [vmem:[%s3165_s5 + $0x2d0] sm:$0xff]  ;;  %v693_v8 = vld [vmem:[%s3165_s5 + $0x2d8] sm:$0xff] }
  0x5a   :  { %1851 = vmatprep.subr.bf16.mxu1 %v1850_v10  ;;  %v612_v10 = vld [vmem:[%s3165_s5 + $0x50] sm:$0xff] }
  0x5b   :  { %v1886_v13 = vpack.c.bf16 %v613_v11, %v612_v10  ;;  %v676_v10 = vld [vmem:[%s3165_s5 + $0x250] sm:$0xff]  ;;  %v677_v11 = vld [vmem:[%s3165_s5 + $0x258] sm:$0xff] }
  0x5c   :  { %v1950_v12 = vpack.c.bf16 %v677_v11, %v676_v10  ;;  %v646_v10 = vld [vmem:[%s3165_s5 + $0x160] sm:$0xff]  ;;  %v647_v11 = vld [vmem:[%s3165_s5 + $0x168] sm:$0xff] }
  0x5d   :  { %1853 = vmatpush3.bf16.msra.mxu1 %v1852_v15  ;;  %v37_v15 = vld [vmem:[%s3167_s7] sm:$0xff] }
  0x5e   :  { %1855 = vmatprep.subr.bf16.mxu1 %v1854_v16  ;;  %v38_v16 = vld [vmem:[%s3167_s7 + $0x8] sm:$0xff] }
  0x61   :  { %1857 = vmatpush3.bf16.msra.mxu1 %v1856_v19  ;;  %v2631_v19 = vpack.c.bf16 %v38_v16, %v37_v15  ;;  %v695_v15 = vld [vmem:[%s3165_s5 + $0x2e8] sm:$0xff] }
  0x62   :  { %1865 = vmatprep.subr.bf16.mxu1 %v1864_v23  ;;  %v39_v23 = vld [vmem:[%s3167_s7 + $0x10] sm:$0xff] }
  0x63   :  { %1860 = vmatpush3.bf16.msra.mxu0 %v2631_v19 }
  0x64   :  { %498 = vmatmul.mubr.f32.vlgmr.msra.gmra.mrb[4].mxu1 %v2440_v37  ;;  %v606_v37 = vld [vmem:[%s3165_s5 + $0x20] sm:$0xff]  ;;  %1861 = vmatprep.subr.bf16.mxu0 %v2047_v14 }
  0x65   :  { %1867 = vmatpush3.bf16.msra.mxu1 %v1866_v28  ;;  %v1874_v42 = vpack.c.bf16 %v607_v38, %v606_v37  ;;  %v633_v28 = vld [vmem:[%s3165_s5 + $0xf8] sm:$0xff]  ;;  %v1894_v37 = vpack.c.bf16 %v617_v33, %v616_v31  ;;  %v2671_v38 = vld [vmem:[%s3168_s2] sm:$0xff] }
  0x66   :  { %1869 = vmatprep.subr.bf16.mxu1 %v1868_v29  ;;  %v2652_v29 = vpack.c.bf16 %v40_v26, %v39_v23  ;;  %v1892_v30 = vpack.c.bf16 %v633_v28, %v632_v27  ;;  %v746_v39 = vrot.slane %v2671_v38, %v2157_v24  ;;  %v697_v23 = vld [vmem:[%s3165_s5 + $0x2f8] sm:$0xff]  ;;  %v680_v26 = vld [vmem:[%s3165_s5 + $0x270] sm:$0xff]  ;;  %v2774_v28 = vld [vmem:[%s3168_s2 + $0x8] sm:$0xff] }
  0x67   :  { %v681_v27 = vld [vmem:[%s3165_s5 + $0x278] sm:$0xff]  ;;  %v763_v31 = vrot.slane %v2774_v28, %v2157_v24 }
  0x68   :  { %1863 = vmatpush3.bf16.msra.mxu0 %v2652_v29 }
  0x69   :  { %1871 = vmatpush3.bf16.msra.mxu1 %v1870_v35  ;;  %v651_v35 = vld [vmem:[%s3165_s5 + $0x188] sm:$0xff]  ;;  %v771_v33 = vcombine.high %v763_v31, %v763_v31 }
  0x6a   :  { %1873 = vmatprep.subr.bf16.mxu1 %v1872_v36  ;;  %v1896_v36 = vpack.c.bf16 %v651_v35, %v650_v34 }
  0x6c   :  { %1897 = vmatprep.subr.bf16.mxu0 %v1896_v36  ;;  %v739_v36 = vcombine.high %v2671_v38, %v2671_v38 }
  0x6d   :  { %1875 = vmatpush3.bf16.msra.mxu1 %v1874_v42  ;;  %v683_v42 = vld [vmem:[%s3165_s5 + $0x288] sm:$0xff] }
  0x6e   :  { %1877 = vmatprep.subr.bf16.mxu1 %v1876_v43  ;;  %v754_v43 = vcombine.high %v746_v39, %v746_v39  ;;  %v1928_v44 = vpack.c.bf16 %v683_v42, %v682_v41  ;;  %v653_v41 = vld [vmem:[%s3165_s5 + $0x198] sm:$0xff] }
  0x70   :  { %845 = vmatprep.mubr.f32.mxu1 %v754_v43 }
  0x71   :  { %1879 = vmatpush3.bf16.msra.mxu1 %v1878_v46  ;;  %v667_v46 = vld [vmem:[%s3165_s5 + $0x208] sm:$0xff] }
  0x72   :  { %1881 = vmatprep.subr.bf16.mxu1 %v1880_v3  ;;  %v1944_v3 = vpack.c.bf16 %v691_v2, %v690_v1  ;;  %v661_v1 = vld [vmem:[%s3165_s5 + $0x1d8] sm:$0xff] }
  0x75   :  { %1883 = vmatpush3.bf16.msra.mxu1 %v1882_v6  ;;  %v1946_v6 = vpack.c.bf16 %v675_v5, %v674_v4  ;;  %v644_v4 = vld [vmem:[%s3165_s5 + $0x150] sm:$0xff]  ;;  %v645_v5 = vld [vmem:[%s3165_s5 + $0x158] sm:$0xff] }
  0x76   :  { %1885 = vmatprep.subr.bf16.mxu1 %v1884_v9  ;;  %v1948_v9 = vpack.c.bf16 %v693_v8, %v692_v7  ;;  %v663_v7 = vld [vmem:[%s3165_s5 + $0x1e8] sm:$0xff]  ;;  %v1918_v8 = vpack.c.bf16 %v645_v5, %v644_v4  ;;  %v712_v5 = vld [vmem:[%s3165_s5 + $0x370] sm:$0xff] }
  0x79   :  { %1887 = vmatpush3.bf16.msra.mxu1 %v1886_v13  ;;  %v694_v13 = vld [vmem:[%s3165_s5 + $0x2e0] sm:$0xff] }
  0x7a   :  { %1889 = vmatprep.subr.bf16.mxu1 %v1888_v20  ;;  %v1952_v16 = vpack.c.bf16 %v695_v15, %v694_v13  ;;  %v679_v20 = vld [vmem:[%s3165_s5 + $0x268] sm:$0xff]  ;;  %v665_v13 = vld [vmem:[%s3165_s5 + $0x1f8] sm:$0xff]  ;;  %v1922_v15 = vpack.c.bf16 %v647_v11, %v646_v10 }
  0x7b   :  { %v1954_v21 = vpack.c.bf16 %v679_v20, %v678_v17  ;;  %v648_v20 = vld [vmem:[%s3165_s5 + $0x170] sm:$0xff] }
  0x7d   :  { %1891 = vmatpush3.bf16.msra.mxu1 %v1890_v25  ;;  %v1956_v25 = vpack.c.bf16 %v697_v23, %v696_v22  ;;  %v714_v22 = vld [vmem:[%s3165_s5 + $0x380] sm:$0xff]  ;;  %v715_v23 = vld [vmem:[%s3165_s5 + $0x388] sm:$0xff] }
  0x7e   :  { %1893 = vmatprep.subr.bf16.mxu1 %v1892_v30  ;;  %v1958_v30 = vpack.c.bf16 %v681_v27, %v680_v26  ;;  %v1960_v27 = vpack.c.bf16 %v715_v23, %v714_v22 }
  0x81   :  { %1895 = vmatpush3.bf16.msra.mxu1 %v1894_v37  ;;  %v2787_v37 = vrot.slane %v739_v36, %v2157_v24  ;;  %v700_v36 = vld [vmem:[%s3165_s5 + $0x310] sm:$0xff] }
  0x82   :  { %1929 = vmatprep.subr.bf16.mxu1 %v1928_v44 }
  0x83   :  { %v755_v43 = vcombine.high %v2787_v37, %v2787_v37 }
  0x84   :  { %846 = vmatmul.mubr.f32.vlgmr.msra.gmra.mrb[6].mxu1 %v746_v39  ;;  %v635_v39 = vld [vmem:[%s3165_s5 + $0x108] sm:$0xff] }
  0x85   :  { %985 = vmatprep.mubr.f32.mxu1 %v771_v33  ;;  %v717_v33 = vld [vmem:[%s3165_s5 + $0x398] sm:$0xff] }
  0xf7   :  { %v1398_v47 = vpop.f32.mrb[0].mxu1 }
  0xf8   :  { %v1399_v48 = vpop.f32.mrb[1].mxu1 }
  0xf9   :  { %v1400_v49 = vadd.f32 %v1399_v48, %v1398_v47  ;;  %v1930_v47 = vpack.c.bf16 %v667_v46, %v666_v45  ;;  %v684_v48 = vld [vmem:[%s3165_s5 + $0x290] sm:$0xff] }
  0xfa   :  { %v636_v46 = vld [vmem:[%s3165_s5 + $0x110] sm:$0xff] }
  0xfb   :  { %v290_v40 = vadd.f32 %v1400_v49, %v1344_v53  ;;  %v685_v49 = vld [vmem:[%s3165_s5 + $0x298] sm:$0xff]  ;;  %1931 = vmatpush3.bf16.msra.mxu1 %v1930_v47 }
  0xfc   :  { %v637_v47 = vld [vmem:[%s3165_s5 + $0x118] sm:$0xff] }
 0x100   :  { %v1468_v50 = vpop.f32.mrb[0].mxu0 }
 0x101   :  { %v1469_v51 = vpop.f32.mrb[1].mxu0 }
 0x102   :  { %v1470_v52 = vadd.f32 %v1469_v51, %v1468_v50  ;;  %v1932_v50 = vpack.c.bf16 %v685_v49, %v684_v48  ;;  %v668_v51 = vld [vmem:[%s3165_s5 + $0x210] sm:$0xff]  ;;  %v654_v48 = vld [vmem:[%s3165_s5 + $0x1a0] sm:$0xff]  ;;  %v655_v49 = vld [vmem:[%s3165_s5 + $0x1a8] sm:$0xff] }
 0x104   :  { %1933 = vmatprep.subr.bf16.mxu1 %v1932_v50  ;;  %v1904_v50 = vpack.c.bf16 %v655_v49, %v654_v48  ;;  %v705_v48 = vld [vmem:[%s3165_s5 + $0x338] sm:$0xff]  ;;  %v722_v49 = vld [vmem:[%s3165_s5 + $0x3c0] sm:$0xff] }
 0x117   :  { %v1433_v54 = vpop.f32.mrb[2].mxu1 }
 0x118   :  { %v1434_v55 = vpop.f32.mrb[3].mxu1 }
 0x119   :  { %v1435_v56 = vadd.f32 %v1434_v55, %v1433_v54  ;;  %v686_v54 = vld [vmem:[%s3165_s5 + $0x2a0] sm:$0xff]  ;;  %v687_v55 = vld [vmem:[%s3165_s5 + $0x2a8] sm:$0xff] }
 0x11b   :  { %v360_v57 = vadd.f32 %v1435_v56, %v290_v40  ;;  %v1936_v40 = vpack.c.bf16 %v687_v55, %v686_v54  ;;  %v670_v56 = vld [vmem:[%s3165_s5 + $0x220] sm:$0xff]  ;;  %v657_v54 = vld [vmem:[%s3165_s5 + $0x1b8] sm:$0xff] }
 0x11d   :  { %v430_v58 = vadd.f32 %v1470_v52, %v360_v57  ;;  %v669_v52 = vld [vmem:[%s3165_s5 + $0x218] sm:$0xff]  ;;  %v671_v57 = vld [vmem:[%s3165_s5 + $0x228] sm:$0xff] }
 0x11e   :  { %v1934_v53 = vpack.c.bf16 %v669_v52, %v668_v51  ;;  %v638_v51 = vld [vmem:[%s3165_s5 + $0x120] sm:$0xff]  ;;  %v639_v52 = vld [vmem:[%s3165_s5 + $0x128] sm:$0xff] }
 0x11f   :  { %v1906_v55 = vpack.c.bf16 %v639_v52, %v638_v51  ;;  %v706_v52 = vld [vmem:[%s3165_s5 + $0x340] sm:$0xff] }
 0x120   :  { %1935 = vmatpush3.bf16.msra.mxu1 %v1934_v53  ;;  %v656_v53 = vld [vmem:[%s3165_s5 + $0x1b0] sm:$0xff] }
 0x121   :  { %1937 = vmatprep.subr.bf16.mxu1 %v1936_v40  ;;  %v1908_v40 = vpack.c.bf16 %v657_v54, %v656_v53  ;;  %v707_v53 = vld [vmem:[%s3165_s5 + $0x348] sm:$0xff]  ;;  %v724_v54 = vld [vmem:[%s3165_s5 + $0x3d0] sm:$0xff] }
 0x137   :  { %v1503_v59 = vpop.f32.mrb[4].mxu1 }
 0x138   :  { %v1504_v60 = vpop.f32.mrb[5].mxu1 }
 0x139   :  { %v1505_v61 = vadd.f32 %v1504_v60, %v1503_v59  ;;  %v688_v59 = vld [vmem:[%s3165_s5 + $0x2b0] sm:$0xff]  ;;  %v689_v60 = vld [vmem:[%s3165_s5 + $0x2b8] sm:$0xff] }
 0x13b   :  { %v500_v62 = vadd.f32 %v1505_v61, %v430_v58  ;;  %v1938_v58 = vpack.c.bf16 %v671_v57, %v670_v56  ;;  %v1940_v61 = vpack.c.bf16 %v689_v60, %v688_v59  ;;  %v640_v56 = vld [vmem:[%s3165_s5 + $0x130] sm:$0xff]  ;;  %v641_v57 = vld [vmem:[%s3165_s5 + $0x138] sm:$0xff]  ;;  %v659_v59 = vld [vmem:[%s3165_s5 + $0x1c8] sm:$0xff] }
 0x13c   :  { %v1910_v60 = vpack.c.bf16 %v641_v57, %v640_v56  ;;  %v708_v57 = vld [vmem:[%s3165_s5 + $0x350] sm:$0xff] }
 0x13d   :  { %v2587_v32 = vmax.f32 %v500_v62, 0.0  ;;  %1939 = vmatpush3.bf16.msra.mxu1 %v1938_v58  ;;  %v672_v62 = vld [vmem:[%s3165_s5 + $0x230] sm:$0xff]  ;;  %v658_v58 = vld [vmem:[%s3165_s5 + $0x1c0] sm:$0xff] }
 0x13e   :  { %1941 = vmatprep.subr.bf16.mxu1 %v1940_v61  ;;  %v1912_v61 = vpack.c.bf16 %v659_v59, %v658_v58  ;;  %v709_v58 = vld [vmem:[%s3165_s5 + $0x358] sm:$0xff]  ;;  %v726_v59 = vld [vmem:[%s3165_s5 + $0x3e0] sm:$0xff] }
 0x13f   :  { %v504_v63 = vmul.f32 %v2587_v32, %v2587_v32 }
 0x141   :  { %v506_v0 = vsel %vm505_vm0, %v504_v63, 0.0  ;;  %v673_v63 = vld [vmem:[%s3165_s5 + $0x238] sm:$0xff] }
 0x142   :  { %507 = vadd.xlane.f32.xlu0 %v506_v0  ;;  %v1942_v0 = vpack.c.bf16 %v673_v63, %v672_v62  ;;  %v642_v62 = vld [vmem:[%s3165_s5 + $0x140] sm:$0xff]  ;;  %v643_v63 = vld [vmem:[%s3165_s5 + $0x148] sm:$0xff] }
 0x143   :  { %v1914_v2 = vpack.c.bf16 %v643_v63, %v642_v62  ;;  %v710_v63 = vld [vmem:[%s3165_s5 + $0x360] sm:$0xff] }
 0x144   :  { %1943 = vmatpush3.bf16.msra.mxu1 %v1942_v0  ;;  %v660_v0 = vld [vmem:[%s3165_s5 + $0x1d0] sm:$0xff] }
 0x145   :  { %1945 = vmatprep.subr.bf16.mxu1 %v1944_v3  ;;  %v1916_v3 = vpack.c.bf16 %v661_v1, %v660_v0  ;;  %v711_v0 = vld [vmem:[%s3165_s5 + $0x368] sm:$0xff]  ;;  %v728_v1 = vld [vmem:[%s3165_s5 + $0x3f0] sm:$0xff] }
 0x148   :  { %1947 = vmatpush3.bf16.msra.mxu1 %v1946_v6  ;;  %v662_v6 = vld [vmem:[%s3165_s5 + $0x1e0] sm:$0xff] }
 0x149   :  { %1949 = vmatprep.subr.bf16.mxu1 %v1948_v9  ;;  %v1920_v9 = vpack.c.bf16 %v663_v7, %v662_v6  ;;  %v713_v6 = vld [vmem:[%s3165_s5 + $0x378] sm:$0xff] }
 0x14a   :  { %v1990_v7 = vpack.c.bf16 %v713_v6, %v712_v5 }
 0x14c   :  { %1951 = vmatpush3.bf16.msra.mxu1 %v1950_v12  ;;  %v664_v12 = vld [vmem:[%s3165_s5 + $0x1f0] sm:$0xff] }
 0x14d   :  { %1953 = vmatprep.subr.bf16.mxu1 %v1952_v16  ;;  %v756_v16 = vcombine.high %v2774_v28, %v2774_v28  ;;  %v1924_v17 = vpack.c.bf16 %v665_v13, %v664_v12  ;;  %v698_v28 = vld [vmem:[%s3165_s5 + $0x300] sm:$0xff] }
 0x14f   :  { %v2892_v26 = vrot.slane %v756_v16, %v2157_v24  ;;  %v1157_v16 = vld [vmem:[%s3169_s9 + $0x8] sm:$0xff] }
 0x150   :  { %1955 = vmatpush3.bf16.msra.mxu1 %v1954_v21  ;;  %v649_v21 = vld [vmem:[%s3165_s5 + $0x178] sm:$0xff] }
 0x151   :  { %1957 = vmatprep.subr.bf16.mxu1 %v1956_v25  ;;  %v1926_v25 = vpack.c.bf16 %v649_v21, %v648_v20 }
 0x154   :  { %1959 = vmatpush3.bf16.msra.mxu1 %v1958_v30  ;;  %v699_v30 = vld [vmem:[%s3165_s5 + $0x308] sm:$0xff] }
 0x155   :  { %1992 = vmatprep.subr.bf16.mxu1 %v2047_v14  ;;  %v1962_v24 = vpack.c.bf16 %v699_v30, %v698_v28 }
 0x157   :  { %986 = vmatmul.mubr.f32.vlgmr.msra.gmra.mrb[8].mxu1 %v763_v31  ;;  %v716_v31 = vld [vmem:[%s3165_s5 + $0x390] sm:$0xff] }
 0x158   :  { %1994 = vmatpush3.bf16.msra.mxu1 %v2631_v19  ;;  %1692 = vmatprep.mubr.msk.f32.mxu1 %vm2048_vm1, %v2049_v18  ;;  %v634_v19 = vld [vmem:[%s3165_s5 + $0x100] sm:$0xff] }
 0x159   :  { %1995 = vmatprep.subr.bf16.mxu1 %v2047_v14  ;;  %v1898_v42 = vpack.c.bf16 %v635_v39, %v634_v19  ;;  %v701_v19 = vld [vmem:[%s3165_s5 + $0x318] sm:$0xff]  ;;  %v718_v39 = vld [vmem:[%s3165_s5 + $0x3a0] sm:$0xff] }
 0x15c   :  { %1997 = vmatpush3.bf16.msra.mxu1 %v2652_v29  ;;  %v652_v29 = vld [vmem:[%s3165_s5 + $0x190] sm:$0xff] }
 0x15d   :  { %v1900_v45 = vpack.c.bf16 %v653_v41, %v652_v29  ;;  %v719_v29 = vld [vmem:[%s3165_s5 + $0x3a8] sm:$0xff]  ;;  %v1966_v41 = vpack.c.bf16 %v701_v19, %v700_v36  ;;  %v1345_v19 = vld [vmem:[%s3171_s8] ss:$0 sm:$0xff] }
 0x1cf   :  { %v508_v34 = vpop.xlane.xlu0 %507 }
 0x1d0   :  { %v509_v35 = vmax.f32 %v508_v34, 1e-24  ;;  %v772_v34 = vcombine.high %v2892_v26, %v2892_v26 }
 0x1d2   :  { %2038 = vrsqrt.f32 %v509_v35  ;;  %v1964_v35 = vpack.c.bf16 %v717_v33, %v716_v31 }
 0x1dc   :  { %v2039_v38 = vpop.eup %2038 }
 0x1dd   :  { %v511_v44 = vmul.f32 %v2039_v38, %v2587_v32  ;;  %v1902_v32 = vpack.c.bf16 %v637_v47, %v636_v46  ;;  %v1968_v38 = vpack.c.bf16 %v719_v29, %v718_v39  ;;  %v704_v47 = vld [vmem:[%s3165_s5 + $0x330] sm:$0xff] }
 0x1df   :  { %1682 = vmatmul.mubr.msk.f32.vlgmr.msra.gmra.mrb[2].mxu0 %vm518_vm2, %v511_v44  ;;  %v720_v44 = vld [vmem:[%s3165_s5 + $0x3b0] sm:$0xff] }
 0x1e0   :  { %1899 = vmatpush3.bf16.msra.mxu0 %v1898_v42  ;;  %915 = vmatprep.mubr.f32.mxu0 %v755_v43  ;;  %v702_v42 = vld [vmem:[%s3165_s5 + $0x320] sm:$0xff]  ;;  %v703_v43 = vld [vmem:[%s3165_s5 + $0x328] sm:$0xff] }
 0x1e1   :  { %1901 = vmatprep.subr.bf16.mxu0 %v1900_v45  ;;  %v1970_v45 = vpack.c.bf16 %v703_v43, %v702_v42 }
 0x1e4   :  { %1903 = vmatpush3.bf16.msra.mxu0 %v1902_v32  ;;  %v723_v32 = vld [vmem:[%s3165_s5 + $0x3c8] sm:$0xff] }
 0x1e5   :  { %1905 = vmatprep.subr.bf16.mxu0 %v1904_v50  ;;  %v1974_v50 = vpack.c.bf16 %v705_v48, %v704_v47  ;;  %v1976_v51 = vpack.c.bf16 %v723_v32, %v722_v49 }
 0x1e8   :  { %1907 = vmatpush3.bf16.msra.mxu0 %v1906_v55  ;;  %v725_v55 = vld [vmem:[%s3165_s5 + $0x3d8] sm:$0xff] }
 0x1e9   :  { %1909 = vmatprep.subr.bf16.mxu0 %v1908_v40  ;;  %v1978_v40 = vpack.c.bf16 %v707_v53, %v706_v52  ;;  %v1980_v56 = vpack.c.bf16 %v725_v55, %v724_v54 }
 0x1ec   :  { %1911 = vmatpush3.bf16.msra.mxu0 %v1910_v60  ;;  %v727_v60 = vld [vmem:[%s3165_s5 + $0x3e8] sm:$0xff] }
 0x1ed   :  { %1913 = vmatprep.subr.bf16.mxu0 %v1912_v61  ;;  %v1982_v61 = vpack.c.bf16 %v709_v58, %v708_v57  ;;  %v1984_v62 = vpack.c.bf16 %v727_v60, %v726_v59 }
 0x1f0   :  { %1915 = vmatpush3.bf16.msra.mxu0 %v1914_v2  ;;  %v729_v2 = vld [vmem:[%s3165_s5 + $0x3f8] sm:$0xff] }
 0x1f1   :  { %1917 = vmatprep.subr.bf16.mxu0 %v1916_v3  ;;  %v1986_v3 = vpack.c.bf16 %v711_v0, %v710_v63  ;;  %v1988_v4 = vpack.c.bf16 %v729_v2, %v728_v1 }
 0x1f4   :  { %1919 = vmatpush3.bf16.msra.mxu0 %v1918_v8  ;;  %v1543_v8 = vpop.f32.mrb[6].mxu1 }
 0x1f5   :  { %1921 = vmatprep.subr.bf16.mxu0 %v1920_v9  ;;  %v1544_v9 = vpop.f32.mrb[7].mxu1 }
 0x1f6   :  { %v2991_v10 = vadd.f32 %v1544_v9, %v1543_v8 }
 0x1f8   :  { %1923 = vmatpush3.bf16.msra.mxu0 %v1922_v15  ;;  %v1156_v15 = vld [vmem:[%s3169_s9] sm:$0xff] }
 0x1f9   :  { %1925 = vmatprep.subr.bf16.mxu0 %v1924_v17  ;;  %v1999_v17 = vpack.c.bf16 %v1157_v16, %v1156_v15  ;;  %1313 = vst.msk [vmem:[%s3170_s12] sm:$0xff] %vm1172_vm3, %v1156_v15  ;;  %1314 = vst.msk [vmem:[%s3170_s12 + $0x8] sm:$0xff] %vm1172_vm3, %v1157_v16 }
 0x1fc   :  { %1927 = vmatpush3.bf16.msra.mxu0 %v1926_v25 }
 0x1fd   :  { %1961 = vmatprep.subr.bf16.mxu0 %v1960_v27 }
 0x1ff   :  { %916 = vmatmul.mubr.f32.vlgmr.msra.gmra.mrb[4].mxu0 %v2787_v37  ;;  %v721_v37 = vld [vmem:[%s3165_s5 + $0x3b8] sm:$0xff] }
 0x200   :  { %1963 = vmatpush3.bf16.msra.mxu0 %v1962_v24  ;;  %1055 = vmatprep.mubr.f32.mxu0 %v772_v34  ;;  %v1972_v46 = vpack.c.bf16 %v721_v37, %v720_v44  ;;  %v1158_v20 = vld [vmem:[%s3169_s9 + $0x10] sm:$0xff]  ;;  %v1159_v21 = vld [vmem:[%s3169_s9 + $0x18] sm:$0xff]  ;;  %v1160_v22 = vld [vmem:[%s3169_s9 + $0x20] sm:$0xff] }
 0x201   :  { %1965 = vmatprep.subr.bf16.mxu0 %v1964_v35  ;;  %1315 = vst.msk [vmem:[%s3170_s12 + $0x10] sm:$0xff] %vm1172_vm3, %v1158_v20  ;;  %1316 = vst.msk [vmem:[%s3170_s12 + $0x18] sm:$0xff] %vm1172_vm3, %v1159_v21  ;;  %v2003_v33 = vpack.c.bf16 %v1159_v21, %v1158_v20 }
 0x204   :  { %1967 = vmatpush3.bf16.msra.mxu0 %v1966_v41 }
 0x205   :  { %1969 = vmatprep.subr.bf16.mxu0 %v1968_v38 }
 0x208   :  { %1971 = vmatpush3.bf16.msra.mxu0 %v1970_v45  ;;  %v1161_v23 = vld [vmem:[%s3169_s9 + $0x28] sm:$0xff] }
 0x209   :  { %1973 = vmatprep.subr.bf16.mxu0 %v1972_v46  ;;  %1317 = vst.msk [vmem:[%s3170_s12 + $0x20] sm:$0xff] %vm1172_vm3, %v1160_v22  ;;  %v2007_v24 = vpack.c.bf16 %v1161_v23, %v1160_v22 }
 0x20c   :  { %1975 = vmatpush3.bf16.msra.mxu0 %v1974_v50 }
 0x20d   :  { %1977 = vmatprep.subr.bf16.mxu0 %v1976_v51 }
 0x210   :  { %1979 = vmatpush3.bf16.msra.mxu0 %v1978_v40  ;;  %v1162_v25 = vld [vmem:[%s3169_s9 + $0x30] sm:$0xff] }
 0x211   :  { %1981 = vmatprep.subr.bf16.mxu0 %v1980_v56 }
 0x214   :  { %1983 = vmatpush3.bf16.msra.mxu0 %v1982_v61 }
 0x215   :  { %1985 = vmatprep.subr.bf16.mxu0 %v1984_v62 }
 0x218   :  { %1987 = vmatpush3.bf16.msra.mxu0 %v1986_v3 }
 0x219   :  { %1989 = vmatprep.subr.bf16.mxu0 %v1988_v4 }
 0x21c   :  { %1991 = vmatpush3.bf16.msra.mxu0 %v1990_v7 }
 0x21d   :  { %1998 = vmatprep.subr.bf16.mxu0 %v2047_v14 }
 0x21f   :  { %1056 = vmatmul.mubr.f32.vlgmr.msra.gmra.mrb[6].mxu0 %v2892_v26  ;;  %v1163_v26 = vld [vmem:[%s3169_s9 + $0x38] sm:$0xff] }
 0x220   :  { %1727 = vmatprep.mubr.msk.f32.mxu0 %vm2048_vm1, %v2049_v18  ;;  %1318 = vst.msk [vmem:[%s3170_s12 + $0x28] sm:$0xff] %vm1172_vm3, %v1161_v23  ;;  %1319 = vst.msk [vmem:[%s3170_s12 + $0x30] sm:$0xff] %vm1172_vm3, %v1162_v25  ;;  %v2011_v34 = vpack.c.bf16 %v1163_v26, %v1162_v25 }
 0x221   :  { %1320 = vst.msk [vmem:[%s3170_s12 + $0x38] sm:$0xff] %vm1172_vm3, %v1163_v26 }
 0x225   :  { %2001 = vmatpush3.bf16.xpose.msk.msra.mxu0 %vm3003_vm4, %v1999_v17 }
 0x226   :  { %2002 = vmatprep.subr.bf16.mxu0 %v2047_v14 }
 0x228   :  { %v1164_v27 = vld [vmem:[%s3169_s9 + $0x40] sm:$0xff]  ;;  %v1165_v28 = vld [vmem:[%s3169_s9 + $0x48] sm:$0xff]  ;;  %v1166_v30 = vld [vmem:[%s3169_s9 + $0x50] sm:$0xff] }
 0x229   :  { %1321 = vst.msk [vmem:[%s3170_s12 + $0x40] sm:$0xff] %vm1172_vm3, %v1164_v27  ;;  %1322 = vst.msk [vmem:[%s3170_s12 + $0x48] sm:$0xff] %vm1172_vm3, %v1165_v28  ;;  %v2015_v35 = vpack.c.bf16 %v1165_v28, %v1164_v27 }
 0x22a   :  { %v1613_v11 = vpop.f32.mrb[8].mxu1 }
 0x22b   :  { %v1614_v12 = vpop.f32.mrb[9].mxu1 }
 0x22c   :  { %v2993_v13 = vadd.f32 %v1614_v12, %v1613_v11 }
 0x22d   :  { %2005 = vmatpush3.bf16.xpose.msk.msra.mxu0 %vm3003_vm4, %v2003_v33 }
 0x22e   :  { %2006 = vmatprep.subr.bf16.mxu0 %v2047_v14 }
 0x230   :  { %v1167_v31 = vld [vmem:[%s3169_s9 + $0x58] sm:$0xff] }
 0x231   :  { %1323 = vst.msk [vmem:[%s3170_s12 + $0x50] sm:$0xff] %vm1172_vm3, %v1166_v30  ;;  %1324 = vst.msk [vmem:[%s3170_s12 + $0x58] sm:$0xff] %vm1172_vm3, %v1167_v31  ;;  %v2019_v36 = vpack.c.bf16 %v1167_v31, %v1166_v30 }
 0x235   :  { %2009 = vmatpush3.bf16.xpose.msk.msra.mxu0 %vm3003_vm4, %v2007_v24 }
 0x236   :  { %2010 = vmatprep.subr.bf16.mxu0 %v2047_v14 }
 0x238   :  { %v1168_v43 = vld [vmem:[%s3169_s9 + $0x60] sm:$0xff]  ;;  %v1169_v44 = vld [vmem:[%s3169_s9 + $0x68] sm:$0xff] }
 0x239   :  { %v2023_v37 = vpack.c.bf16 %v1169_v44, %v1168_v43  ;;  %1325 = vst.msk [vmem:[%s3170_s12 + $0x60] sm:$0xff] %vm1172_vm3, %v1168_v43  ;;  %1326 = vst.msk [vmem:[%s3170_s12 + $0x68] sm:$0xff] %vm1172_vm3, %v1169_v44 }
 0x23d   :  { %2013 = vmatpush3.bf16.xpose.msk.msra.mxu0 %vm3003_vm4, %v2011_v34 }
 0x23e   :  { %2014 = vmatprep.subr.bf16.mxu0 %v2047_v14 }
 0x240   :  { %v1170_v45 = vld [vmem:[%s3169_s9 + $0x70] sm:$0xff]  ;;  %v1171_v46 = vld [vmem:[%s3169_s9 + $0x78] sm:$0xff] }
 0x241   :  { %1327 = vst.msk [vmem:[%s3170_s12 + $0x70] sm:$0xff] %vm1172_vm3, %v1170_v45  ;;  %1328 = vst.msk [vmem:[%s3170_s12 + $0x78] sm:$0xff] %vm1172_vm3, %v1171_v46  ;;  %v2027_v47 = vpack.c.bf16 %v1171_v46, %v1170_v45 }
 0x245   :  { %2017 = vmatpush3.bf16.xpose.msk.msra.mxu0 %vm3003_vm4, %v2015_v35 }
 0x246   :  { %2018 = vmatprep.subr.bf16.mxu0 %v2047_v14 }
 0x24d   :  { %2021 = vmatpush3.bf16.xpose.msk.msra.mxu0 %vm3003_vm4, %v2019_v36 }
 0x24e   :  { %2022 = vmatprep.subr.bf16.mxu0 %v2047_v14 }
 0x255   :  { %2025 = vmatpush3.bf16.xpose.msk.msra.mxu0 %vm3003_vm4, %v2023_v37 }
 0x256   :  { %2026 = vmatprep.subr.bf16.mxu0 %v2047_v14  ;;  %v1347_v14 = vld [vmem:[%s3172_s6] ss:$0 sm:$0xff] }
 0x257   :  { %v848_v48 = vadd.f32 %v2991_v10, %v1347_v14 }
 0x25d   :  { %2029 = vmatpush3.bf16.xpose.msk.msra.mxu0 %vm3003_vm4, %v2027_v47 }
 0x2b2   :  { %v588_v39 = vpop.f32.mrb[2].mxu0 }
 0x2b3   :  { %v589_v29 = vadd.f32 %v1345_v19, %v588_v39  ;;  %v1683_v41 = vpop.f32.mrb[3].mxu0 }
 0x2b5   :  { %v592_v38 = vmul.f32 %v589_v29, %v589_v29 }
 0x2b7   :  { %v594_v42 = vsel %vm593_vm5, %v592_v38, 0.0 }
 0x2b8   :  { %595 = vadd.xlane.f32.xlu1 %v594_v42 }
 0x2d2   :  { %v1578_v49 = vpop.f32.mrb[4].mxu0 }
 0x2d3   :  { %v1579_v32 = vpop.f32.mrb[5].mxu0 }
 0x2d4   :  { %v1580_v50 = vadd.f32 %v1579_v32, %v1578_v49 }
 0x2d6   :  { %v918_v51 = vadd.f32 %v1580_v50, %v848_v48 }
 0x2d8   :  { %v988_v52 = vadd.f32 %v2993_v13, %v918_v51 }
 0x2f2   :  { %v1648_v53 = vpop.f32.mrb[6].mxu0 }
 0x2f3   :  { %v1649_v54 = vpop.f32.mrb[7].mxu0 }
 0x2f4   :  { %v1650_v55 = vadd.f32 %v1649_v54, %v1648_v53 }
 0x2f6   :  { %v1058_v40 = vadd.f32 %v1650_v55, %v988_v52 }
 0x2f8   :  { %v1061_v56 = vmax.f32 %v1058_v40, 0.0 }
 0x2fa   :  { %v1062_v57 = vmul.f32 %v1061_v56, %v1061_v56 }
 0x2fc   :  { %v1063_v58 = vsel %vm505_vm0, %v1062_v57, 0.0 }
 0x2fd   :  { %1064 = vadd.xlane.f32.xlu0 %v1063_v58 }
 0x345   :  { %v596_v59 = vpop.xlane.xlu1 %595 }
 0x346   :  { %v597_v60 = vmax.f32 %v596_v59, 1e-24 }
 0x348   :  { %2040 = vrsqrt.f32 %v597_v60 }
 0x352   :  { %v2041_v61 = vpop.eup %2040 }
 0x353   :  { %v599_v62 = vmul.f32 %v2041_v61, %v589_v29 }
 0x355   :  { %1728 = vmatmul.mubr.msk.f32.vlgmr.msra.gmra.mrb[8].mxu0 %vm1172_vm3, %v599_v62 }
 0x38a   :  { %v1065_v63 = vpop.xlane.xlu0 %1064 }
 0x38b   :  { %v1066_v0 = vmax.f32 %v1065_v63, 1e-24 }
 0x38d   :  { %2042 = vrsqrt.f32 %v1066_v0 }
 0x397   :  { %v2043_v1 = vpop.eup %2042 }
 0x398   :  { %v1068_v2 = vmul.f32 %v2043_v1, %v1061_v56 }
 0x39a   :  { %1693 = vmatmul.mubr.msk.f32.vlgmr.msra.gmra.mrb[10].mxu1 %vm518_vm2, %v1068_v2 }
 0x428   :  { %v1290_v3 = vpop.f32.mrb[8].mxu0 }
 0x429   :  { %v1294_v4 = vmul.f32 14.285714, %v1290_v3  ;;  %v1729_v5 = vpop.f32.mrb[9].mxu0 }
 0x42b   :  { %1295 = vst [vmem:[%s3173_s11] sm:$0x3] %v1294_v4 }
 0x46d   :  { %v1138_v6 = vpop.f32.mrb[10].mxu1 }
 0x46e   :  { %v1139_v7 = vadd.f32 %v1345_v19, %v1138_v6  ;;  %v1694_v8 = vpop.f32.mrb[11].mxu1 }
 0x470   :  { %v1142_v9 = vmul.f32 %v1139_v7, %v1139_v7 }
 0x472   :  { %v1143_v10 = vsel %vm593_vm5, %v1142_v9, 0.0 }
 0x473   :  { %1144 = vadd.xlane.f32.xlu1 %v1143_v10 }
 0x500   :  { %v1145_v11 = vpop.xlane.xlu1 %1144 }
 0x501   :  { %v1146_v12 = vmax.f32 %v1145_v11, 1e-24 }
 0x503   :  { %2044 = vrsqrt.f32 %v1146_v12 }
 0x50d   :  { %v2045_v13 = vpop.eup %2044 }
 0x50e   :  { %v1148_v15 = vmul.f32 %v2045_v13, %v1139_v7 }
 0x510   :  { %v1149_v16 = vmul.f32 %v1148_v15, %v599_v62  ;;  %1330 = vst.msk [vmem:[%s1329_s25] sm:$0x3] %vm593_vm5, %v1148_v15 }
 0x512   :  { %v1150_v18 = vsel %vm593_vm5, %v1149_v16, 0.0 }
 0x513   :  { %1151 = vadd.xlane.f32.xlu0 %v1150_v18 }
 0x5a0   :  { %v1152_v17 = vpop.xlane.xlu0 %1151 }
 0x5a1   :  { %v1153_v20 = vmul.f32 14.285714, %v1152_v17 }
 0x5a3   :  { %1155 = vst.msk [vmem:[%s3175_s10] sm:$0x3] %vm1154_vm6, %v1153_v20 }

</bundles_post_ra>
